<compile_context>
chip_gen: v7x
topology: tpu7x:2x2x1
jax: 0.10.0
libtpu: 0.0.40
codegen_flags: <defaults>
</compile_context>

<pallas_src>
import functools

import jax
import jax.numpy as jnp
from jax.experimental import pallas as pl
from jax.experimental.pallas import tpu as pltpu

BN_EPS = 1e-5
OUT_PAD = 128          # lane-dense padded width of the last layer


# --------------------------------------------------------------------------
# Kernel: three (matmul + bias + relu) stages and one final matmul + bias.
# BN math already folded into w*/b*.  Weights/activations bf16, accum f32.
# --------------------------------------------------------------------------
def mlp_kernel(x_ref,
               w1_ref, b1_ref,
               w2_ref, b2_ref,
               w3_ref, b3_ref,
               wl_ref, bl_ref,
               o_ref):
    # x arrives bf16 from the wrapper; astype is a no-op safeguard if f32.
    h = x_ref[...].astype(jnp.bfloat16)

    h = jnp.dot(h, w1_ref[...], preferred_element_type=jnp.float32) + b1_ref[...]
    h = jnp.maximum(h, 0.0).astype(jnp.bfloat16)

    h = jnp.dot(h, w2_ref[...], preferred_element_type=jnp.float32) + b2_ref[...]
    h = jnp.maximum(h, 0.0).astype(jnp.bfloat16)

    h = jnp.dot(h, w3_ref[...], preferred_element_type=jnp.float32) + b3_ref[...]
    h = jnp.maximum(h, 0.0).astype(jnp.bfloat16)

    out = jnp.dot(h, wl_ref[...], preferred_element_type=jnp.float32) + bl_ref[...]
    o_ref[...] = out.astype(o_ref.dtype)


def _auto_tile(B):
    """Pick the batch tile.

    Large batches: 512-row tiles (M multiple of 256 for the 256-wide MXU on
    v6e/v7x, ~85% of HBM roofline per the measured tile sweep).
    Medium batches: >=2 grid steps of >=128 rows so v7x megacore can shard
    the batch axis across both TensorCores.
    Small / ragged batches: a single full-batch block, avoiding the extra HBM
    pass a wrapper-side jnp.pad of x would cost.
    """
    if B >= 1024 and B % 512 == 0:
        return 512
    for t in (256, 128):
        if B % t == 0 and B // t >= 2:
            return t
    if B <= 2048:
        return B            # single block, no padding needed
    return 512              # large ragged batch: pad fallback (rare)


@functools.partial(jax.jit, static_argnames=("num_classes", "tile_b"))
def classification_mlp2(x, kp, num_classes, tile_b=None):
    B, IN = x.shape
    H = kp["w1"].shape[1]
    OUTP = kp["wl"].shape[1]

    if tile_b is None:
        tile_b = _auto_tile(B)

    # Ragged fallback only (auto-tiling avoids it for typical batch sizes):
    # padding x costs a full extra HBM read+write pass over x.
    Bp = ((B + tile_b - 1) // tile_b) * tile_b
    if Bp != B:
        x = jnp.pad(x, ((0, Bp - B), (0, 0)))

    grid = (Bp // tile_b,)

    x_bytes = Bp * IN * x.dtype.itemsize
    w_bytes = 2 * (IN * H + 2 * H * H + H * OUTP) + 4 * (3 * H + OUTP)
    o_bytes = Bp * OUTP * 2
    cost = pl.CostEstimate(
        flops=2 * Bp * (IN * H + 2 * H * H + H * OUTP),
        transcendentals=0,
        bytes_accessed=x_bytes + w_bytes + o_bytes,
    )

    out = pl.pallas_call(
        mlp_kernel,
        out_shape=jax.ShapeDtypeStruct((Bp, OUTP), jnp.bfloat16),
        grid_spec=pltpu.PrefetchScalarGridSpec(
            num_scalar_prefetch=0,
            grid=grid,
            in_specs=[
                # activations: tiled over the batch grid
                pl.BlockSpec((tile_b, IN), lambda i: (i, 0)),
                # weights / biases: constant index_map -> VMEM-resident
                pl.BlockSpec((IN, H), lambda i: (0, 0)),
                pl.BlockSpec((1, H), lambda i: (0, 0)),
                pl.BlockSpec((H, H), lambda i: (0, 0)),
                pl.BlockSpec((1, H), lambda i: (0, 0)),
                pl.BlockSpec((H, H), lambda i: (0, 0)),
                pl.BlockSpec((1, H), lambda i: (0, 0)),
                pl.BlockSpec((H, OUTP), lambda i: (0, 0)),
                pl.BlockSpec((1, OUTP), lambda i: (0, 0)),
            ],
            out_specs=pl.BlockSpec((tile_b, OUTP), lambda i: (i, 0)),
        ),
        compiler_params=pltpu.CompilerParams(
            dimension_semantics=("parallel",),
        ),
        cost_estimate=cost,
    )(
        x,
        kp["w1"], kp["b1"],
        kp["w2"], kp["b2"],
        kp["w3"], kp["b3"],
        kp["wl"], kp["bl"],
    )
    return out[:B, :num_classes]


# --------------------------------------------------------------------------
# Parameter construction (PyTorch-style raw params) and folding to kernel form
# --------------------------------------------------------------------------
def init_raw_params(key, input_size=256, hidden_size=256, num_classes=2):
    """Deterministic synthetic params with PyTorch shapes (W: (out, in))."""
    ks = jax.random.split(key, 20)

    def linear(kw, kb, fan_in, fan_out):
        bound = 1.0 / jnp.sqrt(fan_in)
        w = jax.random.uniform(kw, (fan_out, fan_in), jnp.float32, -bound, bound)
        b = jax.random.uniform(kb, (fan_out,), jnp.float32, -bound, bound)
        return w, b

    def batchnorm(kg, kb, km, kv, feat):
        gamma = 1.0 + 0.1 * jax.random.normal(kg, (feat,), jnp.float32)
        beta = 0.1 * jax.random.normal(kb, (feat,), jnp.float32)
        mean = 0.1 * jax.random.normal(km, (feat,), jnp.float32)
        var = jax.random.uniform(kv, (feat,), jnp.float32, 0.5, 1.5)
        return (gamma, beta, mean, var)

    w1, b1 = linear(ks[0], ks[1], input_size, hidden_size)
    bn1 = batchnorm(ks[2], ks[3], ks[4], ks[5], hidden_size)
    w2, b2 = linear(ks[6], ks[7], hidden_size, hidden_size)
    bn2 = batchnorm(ks[8], ks[9], ks[10], ks[11], hidden_size)
    w3, b3 = linear(ks[12], ks[13], hidden_size, hidden_size)
    bn3 = batchnorm(ks[14], ks[15], ks[16], ks[17], hidden_size)
    wl, bl = linear(ks[18], ks[19], hidden_size, num_classes)

    return {
        "w1": w1, "b1": b1, "bn1": bn1,
        "w2": w2, "b2": b2, "bn2": bn2,
        "w3": w3, "b3": b3, "bn3": bn3,
        "wl": wl, "bl": bl,
    }


def fold_params(raw):
    """Fold eval-mode BN into the Linear, transpose to (in,out), cast to bf16,
    pad the last layer to OUT_PAD lanes."""

    def fold(w, b, bn):
        gamma, beta, mean, var = bn
        scale = gamma * jax.lax.rsqrt(var + BN_EPS)   # per output feature
        shift = beta - mean * scale
        w_f = (w * scale[:, None]).T                  # (in, out)
        b_f = b * scale + shift                       # (out,)
        return w_f.astype(jnp.bfloat16), b_f.reshape(1, -1).astype(jnp.float32)

    w1, b1 = fold(raw["w1"], raw["b1"], raw["bn1"])
    w2, b2 = fold(raw["w2"], raw["b2"], raw["bn2"])
    w3, b3 = fold(raw["w3"], raw["b3"], raw["bn3"])

    # Last layer: no BN, zero-pad output dim to OUT_PAD for lane-dense stores.
    wl = raw["wl"].T                                  # (in, num_classes)
    bl = raw["bl"].reshape(1, -1)
    nc = wl.shape[1]
    wl = jnp.pad(wl, ((0, 0), (0, OUT_PAD - nc))).astype(jnp.bfloat16)
    bl = jnp.pad(bl, ((0, 0), (0, OUT_PAD - nc))).astype(jnp.float32)

    return {
        "w1": w1, "b1": b1,
        "w2": w2, "b2": b2,
        "w3": w3, "b3": b3,
        "wl": wl, "bl": bl,
    }


def reference_forward(x, p):
    """Pure-JAX f32 reference with exact PyTorch (eval-mode) semantics."""
    def bn_relu(h, bn):
        gamma, beta, mean, var = bn
        return jnp.maximum(
            (h - mean) * jax.lax.rsqrt(var + BN_EPS) * gamma + beta, 0.0)

    h = bn_relu(x @ p["w1"].T + p["b1"], p["bn1"])
    h = bn_relu(h @ p["w2"].T + p["b2"], p["bn2"])
    h = bn_relu(h @ p["w3"].T + p["b3"], p["bn3"])
    return h @ p["wl"].T + p["bl"]


if __name__ == "__main__":
    key = jax.random.PRNGKey(0)
    k_x, k_p = jax.random.split(key)

    B, INPUT, HIDDEN, CLASSES = 256, 256, 256, 2
    x_f32 = jax.random.normal(k_x, (B, INPUT), jnp.float32)
    # Producer-side bf16 activations: halves the dominant HBM stream into the
    # kernel (do NOT rely on a standalone cast pass in a real pipeline —
    # have the upstream op emit bf16 directly).
    x_bf16 = x_f32.astype(jnp.bfloat16)

    raw = init_raw_params(k_p, INPUT, HIDDEN, CLASSES)
    kparams = fold_params(raw)

    out = classification_mlp2(x_bf16, kparams, CLASSES)
    out = jax.block_until_ready(out)

    ref = reference_forward(x_f32, raw)
    assert out.shape == (B, CLASSES), out.shape
    max_err = float(jnp.max(jnp.abs(out.astype(jnp.float32) - ref)))
    # bf16 inputs/weights/logits with f32 MXU accumulation vs a full-f32
    # reference -> loosened tolerance (a structural bug would be O(1)).
    assert max_err < 1e-1, f"max abs err {max_err}"

    print("KERNEL_OK")
</pallas_src>

<mosaic_0001>
module attributes {stable_mosaic.version = 11 : i64} {
  func.func @mlp_kernel(%arg0: i32, %arg1: memref<128x256xbf16, #tpu.memory_space<vmem>>, %arg2: memref<256x256xbf16, #tpu.memory_space<vmem>>, %arg3: memref<1x256xf32, #tpu.memory_space<vmem>>, %arg4: memref<256x256xbf16, #tpu.memory_space<vmem>>, %arg5: memref<1x256xf32, #tpu.memory_space<vmem>>, %arg6: memref<256x256xbf16, #tpu.memory_space<vmem>>, %arg7: memref<1x256xf32, #tpu.memory_space<vmem>>, %arg8: memref<256x128xbf16, #tpu.memory_space<vmem>>, %arg9: memref<1x128xf32, #tpu.memory_space<vmem>>, %arg10: memref<128x128xbf16, #tpu.memory_space<vmem>>) attributes {dimension_semantics = [#tpu.dimension_semantics<parallel>], iteration_bounds = array<i64: 2>, scalar_prefetch = 0 : i64, scratch_operands = 0 : i64, tpu.core_type = #tpu.core_type<tc>, window_params = [{transform_indices = @transform_0, window_bounds = array<i64: 128, 256>}, {pipeline_mode = #tpu.pipeline_mode<synchronous>, transform_indices = @transform_1, window_bounds = array<i64: 256, 256>}, {pipeline_mode = #tpu.pipeline_mode<synchronous>, transform_indices = @transform_2, window_bounds = array<i64: 1, 256>}, {pipeline_mode = #tpu.pipeline_mode<synchronous>, transform_indices = @transform_3, window_bounds = array<i64: 256, 256>}, {pipeline_mode = #tpu.pipeline_mode<synchronous>, transform_indices = @transform_4, window_bounds = array<i64: 1, 256>}, {pipeline_mode = #tpu.pipeline_mode<synchronous>, transform_indices = @transform_5, window_bounds = array<i64: 256, 256>}, {pipeline_mode = #tpu.pipeline_mode<synchronous>, transform_indices = @transform_6, window_bounds = array<i64: 1, 256>}, {pipeline_mode = #tpu.pipeline_mode<synchronous>, transform_indices = @transform_7, window_bounds = array<i64: 256, 128>}, {pipeline_mode = #tpu.pipeline_mode<synchronous>, transform_indices = @transform_8, window_bounds = array<i64: 1, 128>}, {transform_indices = @transform_9, window_bounds = array<i64: 128, 128>}]} {
    %c0 = arith.constant 0 : index
    %c0_0 = arith.constant 0 : index
    %0 = vector.load %arg1[%c0, %c0_0] : memref<128x256xbf16, #tpu.memory_space<vmem>>, vector<128x256xbf16>
    %c0_1 = arith.constant 0 : index
    %c0_2 = arith.constant 0 : index
    %1 = vector.load %arg2[%c0_1, %c0_2] : memref<256x256xbf16, #tpu.memory_space<vmem>>, vector<256x256xbf16>
    %cst = arith.constant dense<0.000000e+00> : vector<128x256xf32>
    %2 = tpu.matmul %0, %1, %cst {dimension_numbers = #tpu.dot_dimension_numbers<[1], [0], [0], [1], [0, 0, 1, 1], [], []>} : vector<128x256xbf16>, vector<256x256xbf16>, vector<128x256xf32> -> vector<128x256xf32>
    %c0_3 = arith.constant 0 : index
    %c0_4 = arith.constant 0 : index
    %3 = vector.load %arg3[%c0_3, %c0_4] : memref<1x256xf32, #tpu.memory_space<vmem>>, vector<1x256xf32>
    %4 = vector.broadcast %3 : vector<1x256xf32> to vector<128x256xf32>
    %5 = arith.addf %2, %4 : vector<128x256xf32>
    %cst_5 = arith.constant 0.000000e+00 : f32
    %6 = vector.broadcast %cst_5 : f32 to vector<128x256xf32>
    %7 = arith.maximumf %5, %6 : vector<128x256xf32>
    %8 = arith.truncf %7 : vector<128x256xf32> to vector<128x256xbf16>
    %c0_6 = arith.constant 0 : index
    %c0_7 = arith.constant 0 : index
    %9 = vector.load %arg4[%c0_6, %c0_7] : memref<256x256xbf16, #tpu.memory_space<vmem>>, vector<256x256xbf16>
    %cst_8 = arith.constant dense<0.000000e+00> : vector<128x256xf32>
    %10 = tpu.matmul %8, %9, %cst_8 {dimension_numbers = #tpu.dot_dimension_numbers<[1], [0], [0], [1], [0, 0, 1, 1], [], []>} : vector<128x256xbf16>, vector<256x256xbf16>, vector<128x256xf32> -> vector<128x256xf32>
    %c0_9 = arith.constant 0 : index
    %c0_10 = arith.constant 0 : index
    %11 = vector.load %arg5[%c0_9, %c0_10] : memref<1x256xf32, #tpu.memory_space<vmem>>, vector<1x256xf32>
    %12 = vector.broadcast %11 : vector<1x256xf32> to vector<128x256xf32>
    %13 = arith.addf %10, %12 : vector<128x256xf32>
    %cst_11 = arith.constant 0.000000e+00 : f32
    %14 = vector.broadcast %cst_11 : f32 to vector<128x256xf32>
    %15 = arith.maximumf %13, %14 : vector<128x256xf32>
    %16 = arith.truncf %15 : vector<128x256xf32> to vector<128x256xbf16>
    %c0_12 = arith.constant 0 : index
    %c0_13 = arith.constant 0 : index
    %17 = vector.load %arg6[%c0_12, %c0_13] : memref<256x256xbf16, #tpu.memory_space<vmem>>, vector<256x256xbf16>
    %cst_14 = arith.constant dense<0.000000e+00> : vector<128x256xf32>
    %18 = tpu.matmul %16, %17, %cst_14 {dimension_numbers = #tpu.dot_dimension_numbers<[1], [0], [0], [1], [0, 0, 1, 1], [], []>} : vector<128x256xbf16>, vector<256x256xbf16>, vector<128x256xf32> -> vector<128x256xf32>
    %c0_15 = arith.constant 0 : index
    %c0_16 = arith.constant 0 : index
    %19 = vector.load %arg7[%c0_15, %c0_16] : memref<1x256xf32, #tpu.memory_space<vmem>>, vector<1x256xf32>
    %20 = vector.broadcast %19 : vector<1x256xf32> to vector<128x256xf32>
    %21 = arith.addf %18, %20 : vector<128x256xf32>
    %cst_17 = arith.constant 0.000000e+00 : f32
    %22 = vector.broadcast %cst_17 : f32 to vector<128x256xf32>
    %23 = arith.maximumf %21, %22 : vector<128x256xf32>
    %24 = arith.truncf %23 : vector<128x256xf32> to vector<128x256xbf16>
    %c0_18 = arith.constant 0 : index
    %c0_19 = arith.constant 0 : index
    %25 = vector.load %arg8[%c0_18, %c0_19] : memref<256x128xbf16, #tpu.memory_space<vmem>>, vector<256x128xbf16>
    %cst_20 = arith.constant dense<0.000000e+00> : vector<128x128xf32>
    %26 = tpu.matmul %24, %25, %cst_20 {dimension_numbers = #tpu.dot_dimension_numbers<[1], [0], [0], [1], [0, 0, 1, 1], [], []>} : vector<128x256xbf16>, vector<256x128xbf16>, vector<128x128xf32> -> vector<128x128xf32>
    %c0_21 = arith.constant 0 : index
    %c0_22 = arith.constant 0 : index
    %27 = vector.load %arg9[%c0_21, %c0_22] : memref<1x128xf32, #tpu.memory_space<vmem>>, vector<1x128xf32>
    %28 = vector.broadcast %27 : vector<1x128xf32> to vector<128x128xf32>
    %29 = arith.addf %26, %28 : vector<128x128xf32>
    %30 = arith.truncf %29 : vector<128x128xf32> to vector<128x128xbf16>
    %c0_23 = arith.constant 0 : index
    %c0_24 = arith.constant 0 : index
    %31 = vector.load %arg10[%c0_23, %c0_24] : memref<128x128xbf16, #tpu.memory_space<vmem>>, vector<128x128xbf16>
    tpu.vector_store %arg10[%c0_23, %c0_24], %30 {strides = array<i32>} : memref<128x128xbf16, #tpu.memory_space<vmem>>, vector<128x128xbf16>,
    return
  }
  func.func @transform_0(%arg0: i32) -> (i32, i32) {
    %c0_i32 = arith.constant 0 : i32
    %c0_i32_0 = arith.constant 0 : i32
    return %arg0, %c0_i32 : i32, i32
  }
  func.func @transform_1(%arg0: i32) -> (i32, i32) {
    %c0_i32 = arith.constant 0 : i32
    %c0_i32_0 = arith.constant 0 : i32
    %c0_i32_1 = arith.constant 0 : i32
    return %c0_i32, %c0_i32_0 : i32, i32
  }
  func.func @transform_2(%arg0: i32) -> (i32, i32) {
    %c0_i32 = arith.constant 0 : i32
    %c0_i32_0 = arith.constant 0 : i32
    %c0_i32_1 = arith.constant 0 : i32
    return %c0_i32, %c0_i32_0 : i32, i32
  }
  func.func @transform_3(%arg0: i32) -> (i32, i32) {
    %c0_i32 = arith.constant 0 : i32
    %c0_i32_0 = arith.constant 0 : i32
    %c0_i32_1 = arith.constant 0 : i32
    return %c0_i32, %c0_i32_0 : i32, i32
  }
  func.func @transform_4(%arg0: i32) -> (i32, i32) {
    %c0_i32 = arith.constant 0 : i32
    %c0_i32_0 = arith.constant 0 : i32
    %c0_i32_1 = arith.constant 0 : i32
    return %c0_i32, %c0_i32_0 : i32, i32
  }
  func.func @transform_5(%arg0: i32) -> (i32, i32) {
    %c0_i32 = arith.constant 0 : i32
    %c0_i32_0 = arith.constant 0 : i32
    %c0_i32_1 = arith.constant 0 : i32
    return %c0_i32, %c0_i32_0 : i32, i32
  }
  func.func @transform_6(%arg0: i32) -> (i32, i32) {
    %c0_i32 = arith.constant 0 : i32
    %c0_i32_0 = arith.constant 0 : i32
    %c0_i32_1 = arith.constant 0 : i32
    return %c0_i32, %c0_i32_0 : i32, i32
  }
  func.func @transform_7(%arg0: i32) -> (i32, i32) {
    %c0_i32 = arith.constant 0 : i32
    %c0_i32_0 = arith.constant 0 : i32
    %c0_i32_1 = arith.constant 0 : i32
    return %c0_i32, %c0_i32_0 : i32, i32
  }
  func.func @transform_8(%arg0: i32) -> (i32, i32) {
    %c0_i32 = arith.constant 0 : i32
    %c0_i32_0 = arith.constant 0 : i32
    %c0_i32_1 = arith.constant 0 : i32
    return %c0_i32, %c0_i32_0 : i32, i32
  }
  func.func @transform_9(%arg0: i32) -> (i32, i32) {
    %c0_i32 = arith.constant 0 : i32
    %c0_i32_0 = arith.constant 0 : i32
    return %arg0, %c0_i32 : i32, i32
  }
}

</mosaic_0001>

<bundles_post_ra>
// kernel: classification_mlp2.1
= control target key start
LH: loop header
LB: loop body
LE: loop exit
PB: predicated region body
PF: predicated region fallthrough
CT: control target
= control target key end

     0   :  { %s3248_s0 = inlined_call_operand.hbm [shape: bf16[256,256], index: 0, kind: input, shape index: {}]   ;;  %s3249_s1 = inlined_call_operand.hbm [shape: bf16[256,256], index: 1, kind: input, shape index: {}]   ;;  %s3250_s2 = inlined_call_operand.vmem [shape: f32[1,256], index: 2, kind: input, shape index: {}]   ;;  %s3251_s3 = inlined_call_operand.hbm [shape: bf16[256,256], index: 3, kind: input, shape index: {}]   ;;  %s3252_s4 = inlined_call_operand.vmem [shape: f32[1,256], index: 4, kind: input, shape index: {}]   ;;  %s3253_s5 = inlined_call_operand.hbm [shape: bf16[256,256], index: 5, kind: input, shape index: {}]   ;;  %s3254_s6 = inlined_call_operand.vmem [shape: f32[1,256], index: 6, kind: input, shape index: {}]   ;;  %s3255_s7 = inlined_call_operand.hbm [shape: bf16[256,128], index: 7, kind: input, shape index: {}]   ;;  %s3256_s8 = inlined_call_operand.vmem [shape: f32[1,128], index: 8, kind: input, shape index: {}]   ;;  %s3257_s9 = inlined_call_operand.vmem [shape: bf16[256,128], index: 9, kind: output, shape index: {}]  }
   0x1   :  { %3263 = sst [smem:[#allocation13_spill]] %s3257_s9 }
   0x2   :  { %14 = vsyncpa [#allocation3], 0 }
   0x3   :  { %16 = vsyncpa [#allocation3 + $0x1], 0 }
   0x4   :  { %17 = vsyncpa [#allocation5], 0 }
   0x5   :  { %18 = vsyncpa [#allocation8], 0  ;;  %s2832_s30 = smov 0   ;;  %s2834_s10 = smov 0  }
   0x6   :  { %s2836_s11 = smov 0   ;;  %s2838_s12 = smov 0  }
   0x7 LB: > { %s3260_s13 = sadd.s32 4294967295, %s2771_s12   ;;  %p44_p0 = scmp.ne.s32.totalorder %s2763_s10, %s2759_s30  ;;  %s2771_s12 = sphi %s2838_s12, %s3279_s12   ;;  %s2767_s11 = sphi %s2836_s11, %s3278_s11   ;;  %s2763_s10 = sphi %s2834_s10, %s3277_s10   ;;  %s2759_s30 = sphi %s2832_s30, %s3276_s30  }
   0x8   : > { %p2854_p1 = scmp.eq.s32.totalorder %s3260_s13, 0  ;;  %p2025_p2 = scmp.ge.s32.totalorder %s2771_s12, 1 }
   0x9   : > { %p249_p3 = scmp.lt.s32.totalorder %s2771_s12, 3  ;;  %s2773_s17 = smov [#allocation4]  }
   0xa   : > { %s3264_s14 = scalar_select %p2854_p1, 1, 0 }
   0xb   : > { %p2862_p4 = por %p2854_p1, %p44_p0  ;;  %p2866_p5 = pnand %p2025_p2, %p249_p3 }
   0xc   : > { %s261_s18 = sshll.u32 %s2773_s17, 4  ;;  %s2774_s20 = smov [#allocation7]   ;;  %s2870_s18 = int_to_ptr.vmem [resolvable:$true] %s261_s18 }
   0xd   : > { %s3265_s15 = scalar_select %p2862_p4, 1, 0 }
   0xe   : > { %s3266_s16 = scalar_select %p2866_p5, 1, 0 }
   0xf   : > { %p2337_p6 = pneg %p2866_p5  ;;  %s293_s21 = sshll.u32 %s2774_s20, 4  ;;  %s2880_s21 = int_to_ptr.vmem [resolvable:$true] %s293_s21 }
  0x10   : > { %s2775_s22 = smov [#allocation6]   ;;  %s2587_s26 = scalar_lea.hbm %s3249_s1, 4096 }
  0x11   : > { %p2876_p7 = pnand %p2337_p6, %p2854_p1  ;;  %s2882_s23 = sshll.u32 %s2775_s22, 4  ;;  %s278_s23 = int_to_ptr.vmem [resolvable:$true] %s2882_s23 }
  0x12   : > { %p2588_p8 = scmp.ne.s32.totalorder %s3249_s1, %s2587_s26  ;;  %p2594_p12 = scmp.lt.u32.totalorder %s2587_s26, %s3249_s1 }
  0x13   : > { %p2892_p9 = pneg %p2876_p7 }
  0x15   : > { %p2590_p10 = pnand %p2892_p9, %p2588_p8 }
  0x17   : > { %p2591_p11 = pneg %p2590_p10 }
  0x19   : > { %p2596_p13 = pnand %p2594_p12, %p2591_p11 }
  0x1b   : > { %2599 = shalt.err (!%p2596_p13)
}
  0x1c   : > { %s2600_s20 = scalar_lea.vmem %s2870_s18, 4096  ;;  %p2608_p6 = scmp.lt.s32.totalorder %s2870_s18, %s2870_s18 }
  0x1d   : > { %p2601_p0 = scmp.ne.s32.totalorder %s2870_s18, %s2600_s20  ;;  %p2609_p1 = scmp.lt.s32.totalorder %s2600_s20, %s2600_s20 }
  0x1f   : > { %p2603_p2 = pnand %p2601_p0, %p2892_p9  ;;  %p2610_p8 = por %p2609_p1, %p2608_p6 }
  0x21   : > { %p2604_p3 = pneg %p2603_p2 }
  0x23   : > { %p2611_p10 = pnand %p2610_p8, %p2604_p3 }
  0x25   : > { %2614 = shalt.err (!%p2611_p10)
}
  0x26   : > { %s2776_s22 = smov 128   ;;  %s2777_s24 = smov 8  }
  0x27   : > { %2340 = dma.hbm_to_vmem [thread:$0]  (!%p2876_p7), %s3249_s1, 4096, %s2870_s18, [#allocation5], %s2776_s22, %s2776_s22, %s2777_s24  }
  0x28   : > { %s2615_s30 = scalar_lea.hbm %s3253_s5, 4096 }
  0x29   : > { %p2616_p1 = scmp.ne.s32.totalorder %s3253_s5, %s2615_s30  ;;  %p2622_p13 = scmp.lt.u32.totalorder %s2615_s30, %s3253_s5 }
  0x2b   : > { %p2618_p11 = pnand %p2616_p1, %p2892_p9 }
  0x2d   : > { %p2619_p12 = pneg %p2618_p11 }
  0x2f   : > { %p2624_p0 = pnand %p2622_p13, %p2619_p12 }
  0x31   : > { %2627 = shalt.err (!%p2624_p0)
}
  0x32   : > { %s2628_s18 = scalar_lea.vmem %s2880_s21, 4096  ;;  %p2636_p8 = scmp.lt.s32.totalorder %s2880_s21, %s2880_s21 }
  0x33   : > { %p2629_p2 = scmp.ne.s32.totalorder %s2880_s21, %s2628_s18  ;;  %p2637_p10 = scmp.lt.s32.totalorder %s2628_s18, %s2628_s18 }
  0x35   : > { %p2631_p3 = pnand %p2629_p2, %p2892_p9  ;;  %p2638_p1 = por %p2637_p10, %p2636_p8 }
  0x37   : > { %p2632_p6 = pneg %p2631_p3 }
  0x39   : > { %p2639_p11 = pnand %p2638_p1, %p2632_p6 }
  0x3b   : > { %2642 = shalt.err (!%p2639_p11)
}
  0x3c   : > { %2346 = dma.hbm_to_vmem [thread:$0]  (!%p2876_p7), %s3253_s5, 4096, %s2880_s21, [#allocation8], %s2776_s22, %s2776_s22, %s2777_s24  }
  0x3d   : > { %s2643_s27 = scalar_lea.hbm %s3251_s3, 4096 }
  0x3e   : > { %p2644_p12 = scmp.ne.s32.totalorder %s3251_s3, %s2643_s27  ;;  %p2650_p2 = scmp.lt.u32.totalorder %s2643_s27, %s3251_s3 }
  0x40   : > { %p2646_p13 = pnand %p2644_p12, %p2892_p9 }
  0x42   : > { %p2647_p0 = pneg %p2646_p13 }
  0x44   : > { %p2652_p3 = pnand %p2650_p2, %p2647_p0 }
  0x46   : > { %2655 = shalt.err (!%p2652_p3)
}
  0x47   : > { %s2656_s18 = scalar_lea.vmem %s278_s23, 4096  ;;  %p2664_p1 = scmp.lt.s32.totalorder %s278_s23, %s278_s23 }
  0x48   : > { %p2657_p6 = scmp.ne.s32.totalorder %s278_s23, %s2656_s18  ;;  %p2665_p11 = scmp.lt.s32.totalorder %s2656_s18, %s2656_s18 }
  0x4a   : > { %p2659_p8 = pnand %p2657_p6, %p2892_p9  ;;  %p2666_p4 = por %p2665_p11, %p2664_p1 }
  0x4c   : > { %p2660_p10 = pneg %p2659_p8 }
  0x4e   : > { %p2667_p5 = pnand %p2666_p4, %p2660_p10 }
  0x50   : > { %2670 = shalt.err (!%p2667_p5)
}
  0x51   : > { %2343 = dma.hbm_to_vmem [thread:$0]  (!%p2876_p7), %s3251_s3, 4096, %s278_s23, [#allocation5], %s2776_s22, %s2776_s22, %s2777_s24  }
  0x52   : > { %s2778_s13 = smov [#allocation9]   ;;  %s2671_s28 = scalar_lea.hbm %s3255_s7, 2048 }
  0x53   : > { %s309_s25 = sshll.u32 %s2778_s13, 4  ;;  %p2672_p4 = scmp.ne.s32.totalorder %s3255_s7, %s2671_s28  ;;  %s310_s25 = int_to_ptr.vmem [resolvable:$true] %s309_s25 }
  0x54   : > { %p2678_p13 = scmp.lt.u32.totalorder %s2671_s28, %s3255_s7 }
  0x55   : > { %p2674_p5 = pnand %p2672_p4, %p2892_p9 }
  0x57   : > { %p2675_p12 = pneg %p2674_p5 }
  0x59   : > { %p2680_p0 = pnand %p2678_p13, %p2675_p12 }
  0x5b   : > { %2683 = shalt.err (!%p2680_p0)
}
  0x5c   : > { %s2684_s23 = scalar_lea.vmem %s310_s25, 2048  ;;  %p2692_p8 = scmp.lt.s32.totalorder %s310_s25, %s310_s25 }
  0x5d   : > { %p2685_p2 = scmp.ne.s32.totalorder %s310_s25, %s2684_s23  ;;  %p2693_p10 = scmp.lt.s32.totalorder %s2684_s23, %s2684_s23 }
  0x5f   : > { %p2687_p3 = pnand %p2685_p2, %p2892_p9  ;;  %p2694_p1 = por %p2693_p10, %p2692_p8 }
  0x61   : > { %p2688_p6 = pneg %p2687_p3 }
  0x63   : > { %p2695_p11 = pnand %p2694_p1, %p2688_p6 }
  0x65   : > { %2698 = shalt.err (!%p2695_p11)
}
  0x66   : > { %s2779_s21 = smov 64   ;;  %s2780_s29 = smov 4  }
  0x67   : > { %2349 = dma.hbm_to_vmem [thread:$0]  (!%p2876_p7), %s3255_s7, 2048, %s310_s25, [#allocation8], %s2779_s21, %s2779_s21, %s2780_s29  }
  0x68   : > { %s2983_s26 = sadd.s32 1, %s2771_s12   ;;  %s31_s28 = sadd.s32 1, %s2767_s11 }
  0x69   : > { %s28_s27 = ssub.s32 %s2771_s12, %s2983_s26  ;;  %p38_p4 = scmp.ne.s32.totalorder %s2767_s11, %s2763_s10 }
  0x6a   : > { %p29_p9 = scmp.eq.s32.totalorder %s28_s27, 0  ;;  %p39_p5 = scmp.eq.s32.totalorder %s2771_s12, 0 }
  0x6b   : > { %p2358_p13 = scmp.lt.s32.totalorder %s2771_s12, 2  ;;  %s326_s17 = sand.u32 1, %s2767_s11  }
  0x6c   : > { %s2992_s30 = scalar_select %p29_p9, %s2767_s11, %s31_s28  }
  0x6d   : > { %p40_p12 = por %p39_p5, %p38_p4  ;;  %s2191_s20 = sshll.u32 %s2771_s12, 11 }
  0x6e   : > { %s2031_s18 = sshll.u32 %s326_s17, 7  ;;  %s3000_s9 = scalar_lea.hbm %s3248_s0, %s2191_s20 }
  0x6f   : > { %s330_s25 = scalar_lea.vmem [#allocation2], %s2031_s18  ;;  %p3002_p7 = pnand %p2358_p13, %p40_p12 }
  0x70   : > { %s338_s21 = sshll.u32 %s330_s25, 4  ;;  %s3008_s13 = scalar_lea.sflag [#allocation3], %s326_s17  ;;  %s3006_s21 = int_to_ptr.vmem [resolvable:$true] %s338_s21 }
  0x71   : > { %s2699_s27 = scalar_lea.hbm %s3000_s9, 2048  ;;  %p2701_p2 = pneg %p3002_p7 }
  0x72   : > { %p2700_p0 = scmp.ne.s32.totalorder %s3000_s9, %s2699_s27  ;;  %s2704_s18 = scalar_lea.hbm %s3248_s0, 4096 }
  0x73   : > { %p2705_p8 = scmp.lt.u32.totalorder %s3000_s9, %s3248_s0  ;;  %p2706_p10 = scmp.lt.u32.totalorder %s2704_s18, %s2699_s27 }
  0x74   : > { %p2702_p3 = pnand %p2701_p2, %p2700_p0  ;;  %p2708_p11 = scmp.lt.u32.totalorder %s2699_s27, %s3000_s9 }
  0x75   : > { %p2707_p1 = por %p2706_p10, %p2705_p8 }
  0x76   : > { %p2703_p6 = pneg %p2702_p3 }
  0x77   : > { %p2709_p9 = por %p2708_p11, %p2707_p1 }
  0x79   : > { %p2710_p4 = pnand %p2709_p9, %p2703_p6 }
  0x7b   : > { %2713 = shalt.err (!%p2710_p4)
}
  0x7c   : > { %s2714_s17 = scalar_lea.vmem %s3006_s21, 2048  ;;  %s2781_s25 = smov [#allocation2]  }
  0x7d   : > { %p2715_p5 = scmp.ne.s32.totalorder %s3006_s21, %s2714_s17  ;;  %s2719_s28 = sshll.u32 %s2781_s25, 4  ;;  %s2720_s28 = int_to_ptr.vmem [resolvable:$false] %s2719_s28 }
  0x7e   : > { %s2721_s20 = scalar_lea.vmem %s2720_s28, 4096  ;;  %p2722_p0 = scmp.lt.s32.totalorder %s3006_s21, %s2720_s28 }
  0x7f   : > { %p2717_p12 = pnand %p2715_p5, %p2701_p2  ;;  %p2723_p3 = scmp.lt.s32.totalorder %s2721_s20, %s2714_s17 }
  0x81   : > { %p2718_p13 = pneg %p2717_p12  ;;  %p2724_p8 = por %p2723_p3, %p2722_p0 }
  0x83   : > { %p2725_p10 = pnand %p2724_p8, %p2718_p13 }
  0x85   : > { %2728 = shalt.err (!%p2725_p10)
}
  0x86   : > { %2353 = dma.hbm_to_vmem [thread:$0]  (!%p3002_p7), %s3000_s9, 2048, %s3006_s21, %s3008_s13, %s2776_s22, %s2776_s22, %s2777_s24  }
  0x87   : > { %p3270_p2 = scmp.ne.s32.totalorder %s3266_s16, 0 }
  0x88   : > { %s352_s27 = sand.u32 (!%p3270_p2), 1, %s2763_s10   ;;  %p3271_p6 = scmp.ne.s32.totalorder (!%p3270_p2), %s3265_s15, 0 }
  0x89   : > { %350 = sbr.rel (%p3270_p2) target bundleno = 1159 (0x487), region = 56  ;;  %s2036_s18 = sshll.u32 (!%p3270_p2), %s352_s27, 7 }
  0x8a   : > { %s353_s19 = scalar_lea.sflag (!%p3270_p2), [#allocation3], %s352_s27  ;;  %s3042_s23 = scalar_lea.vmem (!%p3270_p2), [#allocation2], %s2036_s18 }
  0x90   : > { %2746 = dma.done.wait (%p3271_p6), %s353_s19, 2048  }
  0x91   : > { %2748 = vsyncadd (%p3271_p6), %s353_s19, 4294965248  ;;  %p3272_p1 = scmp.ne.s32.totalorder %s3264_s14, 0 }
  0x93   : > { %2750 = dma.done.wait (%p3272_p1), [#allocation5], 8192  }
  0x94   : > { %2752 = vsyncadd (%p3272_p1), [#allocation5], 4294959104 }
  0x95   : > { %2754 = dma.done.wait (%p3272_p1), [#allocation8], 6144  }
  0x96   : > { %2756 = vsyncadd (%p3272_p1), [#allocation8], 4294961152  ;;  %v2403_v0 = vld [vmem:[#allocation4 + $0x4] ss:$8 sps:$4 sm:$0xff]   ;;  %v2405_v1 = vld [vmem:[#allocation4] ss:$8 sps:$4 sm:$0xff]  }
  0x97   : > { %715 = vmatprep.subr.bf16.mxu0 %v2403_v0  ;;  %v2406_v2 = vld [vmem:[#allocation4 + $0x14] ss:$8 sps:$4 sm:$0xff]   ;;  %v2408_v3 = vld [vmem:[#allocation4 + $0x10] ss:$8 sps:$4 sm:$0xff]   ;;  %v2409_v4 = vld [vmem:[#allocation4 + $0x24] ss:$8 sps:$4 sm:$0xff]  }
  0x98   : > { %716 = vmatpush1.bf16.msra.mxu0 %v2405_v1  ;;  %v2411_v5 = vld [vmem:[#allocation4 + $0x20] ss:$8 sps:$4 sm:$0xff]   ;;  %v2412_v6 = vld [vmem:[#allocation4 + $0x34] ss:$8 sps:$4 sm:$0xff]   ;;  %v2414_v7 = vld [vmem:[#allocation4 + $0x30] ss:$8 sps:$4 sm:$0xff]  }
  0x99   : > { %717 = vmatprep.subr.bf16.mxu0 %v2406_v2  ;;  %v2415_v8 = vld [vmem:[#allocation4 + $0x44] ss:$8 sps:$4 sm:$0xff]   ;;  %v2417_v9 = vld [vmem:[#allocation4 + $0x40] ss:$8 sps:$4 sm:$0xff]   ;;  %v2418_v10 = vld [vmem:[#allocation4 + $0x54] ss:$8 sps:$4 sm:$0xff]  }
  0x9a   : > { %v2420_v11 = vld [vmem:[#allocation4 + $0x50] ss:$8 sps:$4 sm:$0xff]   ;;  %v2421_v12 = vld [vmem:[#allocation4 + $0x64] ss:$8 sps:$4 sm:$0xff]   ;;  %v2423_v14 = vld [vmem:[#allocation4 + $0x60] ss:$8 sps:$4 sm:$0xff]  }
  0x9b   : > { %v2453_v13 = vld [vmem:[%s3042_s23 + $0x4] ss:$8 sps:$4 sm:$0xff]   ;;  %v2424_v15 = vld [vmem:[#allocation4 + $0x74] ss:$8 sps:$4 sm:$0xff]   ;;  %v2426_v16 = vld [vmem:[#allocation4 + $0x70] ss:$8 sps:$4 sm:$0xff]  }
  0x9c   : > { %718 = vmatpush1.bf16.msra.mxu0 %v2408_v3  ;;  %747 = vmatprep.mubr.bf16.mxu0 %v2453_v13  ;;  %v2427_v17 = vld [vmem:[#allocation4 + $0x84] ss:$8 sps:$4 sm:$0xff]   ;;  %v2429_v18 = vld [vmem:[#allocation4 + $0x80] ss:$8 sps:$4 sm:$0xff]   ;;  %v2430_v19 = vld [vmem:[#allocation4 + $0x94] ss:$8 sps:$4 sm:$0xff]  }
  0x9d   : > { %719 = vmatprep.subr.bf16.mxu0 %v2409_v4  ;;  %v2475_v20 = vld [vmem:[#allocation6 + $0x4] ss:$8 sps:$4 sm:$0xff]   ;;  %v2477_v21 = vld [vmem:[#allocation6] ss:$8 sps:$4 sm:$0xff]   ;;  %v2432_v22 = vld [vmem:[#allocation4 + $0x90] ss:$8 sps:$4 sm:$0xff]  }
  0x9e   : > { %1080 = vmatprep.subr.bf16.mxu1 %v2475_v20  ;;  %v2478_v23 = vld [vmem:[#allocation6 + $0x14] ss:$8 sps:$4 sm:$0xff]   ;;  %v2433_v24 = vld [vmem:[#allocation4 + $0xa4] ss:$8 sps:$4 sm:$0xff]   ;;  %v2480_v25 = vld [vmem:[#allocation6 + $0x10] ss:$8 sps:$4 sm:$0xff]  }
  0x9f   : > { %1081 = vmatpush1.bf16.msra.mxu1 %v2477_v21  ;;  %v2481_v26 = vld [vmem:[#allocation6 + $0x24] ss:$8 sps:$4 sm:$0xff]   ;;  %v2435_v27 = vld [vmem:[#allocation4 + $0xa0] ss:$8 sps:$4 sm:$0xff]   ;;  %v2436_v28 = vld [vmem:[#allocation4 + $0xb4] ss:$8 sps:$4 sm:$0xff]  }
  0xa0   : > { %720 = vmatpush1.bf16.msra.mxu0 %v2411_v5  ;;  %1082 = vmatprep.subr.bf16.mxu1 %v2478_v23  ;;  %v2483_v29 = vld [vmem:[#allocation6 + $0x20] ss:$8 sps:$4 sm:$0xff]   ;;  %v2484_v30 = vld [vmem:[#allocation6 + $0x34] ss:$8 sps:$4 sm:$0xff]   ;;  %v2438_v31 = vld [vmem:[#allocation4 + $0xb0] ss:$8 sps:$4 sm:$0xff]  }
  0xa1   : > { %721 = vmatprep.subr.bf16.mxu0 %v2412_v6  ;;  %v2439_v32 = vld [vmem:[#allocation4 + $0xc4] ss:$8 sps:$4 sm:$0xff]   ;;  %v2486_v33 = vld [vmem:[#allocation6 + $0x30] ss:$8 sps:$4 sm:$0xff]   ;;  %v2441_v35 = vld [vmem:[#allocation4 + $0xc0] ss:$8 sps:$4 sm:$0xff]  }
  0xa2   : > { %v2487_v34 = vld [vmem:[#allocation6 + $0x44] ss:$8 sps:$4 sm:$0xff]   ;;  %v2442_v36 = vld [vmem:[#allocation4 + $0xd4] ss:$8 sps:$4 sm:$0xff]   ;;  %v2489_v37 = vld [vmem:[#allocation6 + $0x40] ss:$8 sps:$4 sm:$0xff]  }
  0xa3   : > { %1083 = vmatpush1.bf16.msra.mxu1 %v2480_v25  ;;  %v2490_v38 = vld [vmem:[#allocation6 + $0x54] ss:$8 sps:$4 sm:$0xff]   ;;  %v2444_v39 = vld [vmem:[#allocation4 + $0xd0] ss:$8 sps:$4 sm:$0xff]   ;;  %v2445_v40 = vld [vmem:[#allocation4 + $0xe4] ss:$8 sps:$4 sm:$0xff]  }
  0xa4   : > { %722 = vmatpush1.bf16.msra.mxu0 %v2414_v7  ;;  %1084 = vmatprep.subr.bf16.mxu1 %v2481_v26  ;;  %v2492_v41 = vld [vmem:[#allocation6 + $0x50] ss:$8 sps:$4 sm:$0xff]   ;;  %v2493_v42 = vld [vmem:[#allocation6 + $0x64] ss:$8 sps:$4 sm:$0xff]   ;;  %v2447_v43 = vld [vmem:[#allocation4 + $0xe0] ss:$8 sps:$4 sm:$0xff]  }
  0xa5   : > { %723 = vmatprep.subr.bf16.mxu0 %v2415_v8  ;;  %v2495_v44 = vld [vmem:[#allocation6 + $0x60] ss:$8 sps:$4 sm:$0xff]   ;;  %v2448_v45 = vld [vmem:[#allocation4 + $0xf4] ss:$8 sps:$4 sm:$0xff]   ;;  %v2450_v47 = vld [vmem:[#allocation4 + $0xf0] ss:$8 sps:$4 sm:$0xff]  }
  0xa6   : > { %v2496_v46 = vld [vmem:[#allocation6 + $0x74] ss:$8 sps:$4 sm:$0xff]   ;;  %v2498_v48 = vld [vmem:[#allocation6 + $0x70] ss:$8 sps:$4 sm:$0xff]   ;;  %v2499_v49 = vld [vmem:[#allocation6 + $0x84] ss:$8 sps:$4 sm:$0xff]  }
  0xa7   : > { %1085 = vmatpush1.bf16.msra.mxu1 %v2483_v29  ;;  %v2451_v50 = vld [vmem:[%s3042_s23] ss:$8 sps:$4 sm:$0xff]   ;;  %v2454_v51 = vld [vmem:[%s3042_s23 + $0x14] ss:$8 sps:$4 sm:$0xff]   ;;  %v2504_v54 = vld [vmem:[#allocation6 + $0x90] ss:$8 sps:$4 sm:$0xff]  }
  0xa8   : > { %724 = vmatpush1.bf16.msra.mxu0 %v2417_v9  ;;  %1086 = vmatprep.subr.bf16.mxu1 %v2484_v30  ;;  %v2501_v52 = vld [vmem:[#allocation6 + $0x80] ss:$8 sps:$4 sm:$0xff]   ;;  %v2502_v53 = vld [vmem:[#allocation6 + $0x94] ss:$8 sps:$4 sm:$0xff]   ;;  %v2505_v55 = vld [vmem:[#allocation6 + $0xa4] ss:$8 sps:$4 sm:$0xff]  }
  0xa9   : > { %725 = vmatprep.subr.bf16.mxu0 %v2418_v10  ;;  %v2456_v56 = vld [vmem:[%s3042_s23 + $0x10] ss:$8 sps:$4 sm:$0xff]   ;;  %v2457_v57 = vld [vmem:[%s3042_s23 + $0x24] ss:$8 sps:$4 sm:$0xff]   ;;  %v2507_v58 = vld [vmem:[#allocation6 + $0xa0] ss:$8 sps:$4 sm:$0xff]  }
  0xaa   : > { %v2508_v59 = vld [vmem:[#allocation6 + $0xb4] ss:$8 sps:$4 sm:$0xff]   ;;  %v2510_v60 = vld [vmem:[#allocation6 + $0xb0] ss:$8 sps:$4 sm:$0xff]   ;;  %v2511_v61 = vld [vmem:[#allocation6 + $0xc4] ss:$8 sps:$4 sm:$0xff]  }
  0xab   : > { %1087 = vmatpush1.bf16.msra.mxu1 %v2486_v33  ;;  %v2459_v62 = vld [vmem:[%s3042_s23 + $0x20] ss:$8 sps:$4 sm:$0xff]   ;;  %v2460_v63 = vld [vmem:[%s3042_s23 + $0x34] ss:$8 sps:$4 sm:$0xff]   ;;  %v2462_v2 = vld [vmem:[%s3042_s23 + $0x30] ss:$8 sps:$4 sm:$0xff]  }
  0xac   : > { %726 = vmatpush1.bf16.msra.mxu0 %v2420_v11  ;;  %1088 = vmatprep.subr.bf16.mxu1 %v2487_v34  ;;  %v2513_v0 = vld [vmem:[#allocation6 + $0xc0] ss:$8 sps:$4 sm:$0xff]   ;;  %v2514_v1 = vld [vmem:[#allocation6 + $0xd4] ss:$8 sps:$4 sm:$0xff]   ;;  %v2463_v3 = vld [vmem:[%s3042_s23 + $0x44] ss:$8 sps:$4 sm:$0xff]  }
  0xad   : > { %727 = vmatprep.subr.bf16.mxu0 %v2421_v12  ;;  %v2465_v4 = vld [vmem:[%s3042_s23 + $0x40] ss:$8 sps:$4 sm:$0xff]   ;;  %v2466_v5 = vld [vmem:[%s3042_s23 + $0x54] ss:$8 sps:$4 sm:$0xff]   ;;  %v2468_v6 = vld [vmem:[%s3042_s23 + $0x50] ss:$8 sps:$4 sm:$0xff]  }
  0xae   : > { %v2469_v7 = vld [vmem:[%s3042_s23 + $0x64] ss:$8 sps:$4 sm:$0xff]   ;;  %v2471_v8 = vld [vmem:[%s3042_s23 + $0x60] ss:$8 sps:$4 sm:$0xff]   ;;  %v2472_v9 = vld [vmem:[%s3042_s23 + $0x74] ss:$8 sps:$4 sm:$0xff]  }
  0xaf   : > { %1089 = vmatpush1.bf16.msra.mxu1 %v2489_v37  ;;  %v2474_v10 = vld [vmem:[%s3042_s23 + $0x70] ss:$8 sps:$4 sm:$0xff]   ;;  %v2517_v12 = vld [vmem:[#allocation6 + $0xe4] ss:$8 sps:$4 sm:$0xff]   ;;  %v2519_v13 = vld [vmem:[#allocation6 + $0xe0] ss:$8 sps:$4 sm:$0xff]  }
  0xb0   : > { %728 = vmatpush1.bf16.msra.mxu0 %v2423_v14  ;;  %1090 = vmatprep.subr.bf16.mxu1 %v2490_v38  ;;  %v2516_v11 = vld [vmem:[#allocation6 + $0xd0] ss:$8 sps:$4 sm:$0xff]   ;;  %v2520_v14 = vld [vmem:[#allocation6 + $0xf4] ss:$8 sps:$4 sm:$0xff]   ;;  %v2531_v20 = vld [vmem:[#allocation7 + $0x24] ss:$8 sps:$4 sm:$0xff]  }
  0xb1   : > { %729 = vmatprep.subr.bf16.mxu0 %v2424_v15  ;;  %v2522_v15 = vld [vmem:[#allocation6 + $0xf0] ss:$8 sps:$4 sm:$0xff]   ;;  %v2529_v21 = vld [vmem:[#allocation7 + $0x20] ss:$8 sps:$4 sm:$0xff]   ;;  %v2540_v26 = vld [vmem:[#allocation7 + $0x54] ss:$8 sps:$4 sm:$0xff]  }
  0xb2   : > { %v2532_v23 = vld [vmem:[#allocation7 + $0x30] ss:$8 sps:$4 sm:$0xff]   ;;  %v2535_v25 = vld [vmem:[#allocation7 + $0x40] ss:$8 sps:$4 sm:$0xff]   ;;  %v2546_v30 = vld [vmem:[#allocation7 + $0x74] ss:$8 sps:$4 sm:$0xff]  }
  0xb3   : > { %1091 = vmatpush1.bf16.msra.mxu1 %v2492_v41  ;;  %v2541_v29 = vld [vmem:[#allocation7 + $0x60] ss:$8 sps:$4 sm:$0xff]   ;;  %v2552_v34 = vld [vmem:[#allocation7 + $0x94] ss:$8 sps:$4 sm:$0xff]   ;;  %v465_v41 = vlaneseq  ;;  %s3273_s21 = sadd.s32 4294967295, %s2771_s12   ;;  %s3274_s20 = sld [smem:[#allocation13_spill]] }
  0xb4   : > { %730 = vmatpush1.bf16.msra.mxu0 %v2426_v16  ;;  %1092 = vmatprep.subr.bf16.mxu1 %v2493_v42  ;;  %v2523_v16 = vld [vmem:[#allocation7] ss:$8 sps:$4 sm:$0xff]   ;;  %v2558_v38 = vld [vmem:[#allocation7 + $0xb4] ss:$8 sps:$4 sm:$0xff]   ;;  %s2041_s29 = sshll.u32 %s3273_s21, 4 }
  0xb5   : > { %731 = vmatprep.subr.bf16.mxu0 %v2427_v17  ;;  %v2525_v17 = vld [vmem:[#allocation7 + $0x4] ss:$8 sps:$4 sm:$0xff]   ;;  %v2547_v33 = vld [vmem:[#allocation7 + $0x80] ss:$8 sps:$4 sm:$0xff]   ;;  %p409_p7 = scmp.lt.s32.totalorder %s2041_s29, 31 }
  0xb6   : > { %v2553_v37 = vld [vmem:[#allocation7 + $0xa0] ss:$8 sps:$4 sm:$0xff]  }
  0xb7   : > { %1093 = vmatpush1.bf16.msra.mxu1 %v2495_v44  ;;  %v2559_v42 = vld [vmem:[#allocation7 + $0xc0] ss:$8 sps:$4 sm:$0xff]   ;;  %v466_v44 = vshrl.u32 %v465_v41, 7  ;;  %s3281_s29 = smov (!%p409_p7, %s2041_s29), 31 }
  0xb8   : > { %732 = vmatpush1.bf16.msra.mxu0 %v2429_v18  ;;  %1094 = vmatprep.subr.bf16.mxu1 %v2496_v46  ;;  %v2528_v18 = vld [vmem:[#allocation7 + $0x14] ss:$8 sps:$4 sm:$0xff]   ;;  %s2042_s25 = sshll.u32 %s3281_s29, 2 }
  0xb9   : > { %733 = vmatprep.subr.bf16.mxu0 %v2430_v19  ;;  %v2526_v19 = vld [vmem:[#allocation7 + $0x10] ss:$8 sps:$4 sm:$0xff]   ;;  %v3072_v46 = vsub.s32 0, %v466_v44  ;;  %s3211_s27 = scalar_lea.vmem %s3274_s20, %s2042_s25 }
  0xbb   : > { %1095 = vmatpush1.bf16.msra.mxu1 %v2498_v48  ;;  %v3077_v48 = vsub.s32 1, %v466_v44 }
  0xbc   : > { %734 = vmatpush1.bf16.msra.mxu0 %v2432_v22  ;;  %1096 = vmatprep.subr.bf16.mxu1 %v2499_v49  ;;  %v2534_v22 = vld [vmem:[#allocation7 + $0x34] ss:$8 sps:$4 sm:$0xff]  }
  0xbd   : > { %735 = vmatprep.subr.bf16.mxu0 %v2433_v24  ;;  %v2537_v24 = vld [vmem:[#allocation7 + $0x44] ss:$8 sps:$4 sm:$0xff]  }
  0xbf   : > { %1097 = vmatpush1.bf16.msra.mxu1 %v2501_v52 }
  0xc0   : > { %736 = vmatpush1.bf16.msra.mxu0 %v2435_v27  ;;  %1098 = vmatprep.subr.bf16.mxu1 %v2502_v53  ;;  %v2538_v27 = vld [vmem:[#allocation7 + $0x50] ss:$8 sps:$4 sm:$0xff]  }
  0xc1   : > { %737 = vmatprep.subr.bf16.mxu0 %v2436_v28  ;;  %v2543_v28 = vld [vmem:[#allocation7 + $0x64] ss:$8 sps:$4 sm:$0xff]  }
  0xc3   : > { %1099 = vmatpush1.bf16.msra.mxu1 %v2504_v54 }
  0xc4   : > { %738 = vmatpush1.bf16.msra.mxu0 %v2438_v31  ;;  %1100 = vmatprep.subr.bf16.mxu1 %v2505_v55  ;;  %v2544_v31 = vld [vmem:[#allocation7 + $0x70] ss:$8 sps:$4 sm:$0xff]  }
  0xc5   : > { %739 = vmatprep.subr.bf16.mxu0 %v2439_v32  ;;  %v2549_v32 = vld [vmem:[#allocation7 + $0x84] ss:$8 sps:$4 sm:$0xff]  }
  0xc7   : > { %1101 = vmatpush1.bf16.msra.mxu1 %v2507_v58 }
  0xc8   : > { %740 = vmatpush1.bf16.msra.mxu0 %v2441_v35  ;;  %1102 = vmatprep.subr.bf16.mxu1 %v2508_v59  ;;  %v2550_v35 = vld [vmem:[#allocation7 + $0x90] ss:$8 sps:$4 sm:$0xff]  }
  0xc9   : > { %741 = vmatprep.subr.bf16.mxu0 %v2442_v36  ;;  %v2555_v36 = vld [vmem:[#allocation7 + $0xa4] ss:$8 sps:$4 sm:$0xff]  }
  0xcb   : > { %1103 = vmatpush1.bf16.msra.mxu1 %v2510_v60 }
  0xcc   : > { %742 = vmatpush1.bf16.msra.mxu0 %v2444_v39  ;;  %1104 = vmatprep.subr.bf16.mxu1 %v2511_v61  ;;  %v2556_v39 = vld [vmem:[#allocation7 + $0xb0] ss:$8 sps:$4 sm:$0xff]  }
  0xcd   : > { %743 = vmatprep.subr.bf16.mxu0 %v2445_v40  ;;  %v2561_v40 = vld [vmem:[#allocation7 + $0xc4] ss:$8 sps:$4 sm:$0xff]  }
  0xcf   : > { %1105 = vmatpush1.bf16.msra.mxu1 %v2513_v0 }
  0xd0   : > { %744 = vmatpush1.bf16.msra.mxu0 %v2447_v43  ;;  %1106 = vmatprep.subr.bf16.mxu1 %v2514_v1  ;;  %v2564_v43 = vld [vmem:[#allocation7 + $0xd4] ss:$8 sps:$4 sm:$0xff]  }
  0xd1   : > { %745 = vmatprep.subr.bf16.mxu0 %v2448_v45  ;;  %v2562_v45 = vld [vmem:[#allocation7 + $0xd0] ss:$8 sps:$4 sm:$0xff]  }
  0xd3   : > { %1107 = vmatpush1.bf16.msra.mxu1 %v2516_v11 }
  0xd4   : > { %746 = vmatpush1.bf16.msra.mxu0 %v2450_v47  ;;  %1108 = vmatprep.subr.bf16.mxu1 %v2517_v12  ;;  %v463_v47 = vld [vmem:[%s3250_s2] sm:$0x3] }
  0xd5   : > { %1445 = vmatprep.subr.bf16.mxu0 %v2525_v17  ;;  %v3080_v49 = vrot.slane %v463_v47, %v3072_v46 }
  0xd7   : > { %748 = vmatmul.mubr.bf16.vlgmr.msra.gmra.mrb[0].mxu0 %v2451_v50  ;;  %1109 = vmatpush1.bf16.msra.mxu1 %v2519_v13  ;;  %v3083_v50 = vrot.slane %v463_v47, %v3077_v48 }
  0xd8   : > { %757 = vmatprep.mubr.bf16.mxu0 %v2454_v51  ;;  %1110 = vmatprep.subr.bf16.mxu1 %v2520_v14 }
  0xd9   : > { %1446 = vmatpush1.bf16.msra.mxu0 %v2523_v16 }
  0xda   : > { %1447 = vmatprep.subr.bf16.mxu0 %v2528_v18 }
  0xdb   : > { %1111 = vmatpush1.bf16.msra.mxu1 %v2522_v15 }
  0xdd   : > { %1448 = vmatpush1.bf16.msra.mxu0 %v2526_v19 }
  0xde   : > { %1449 = vmatprep.subr.bf16.mxu0 %v2531_v20 }
  0xdf   : > { %758 = vmatmul.mubr.bf16.gmra.mrb[4].mxu0 %v2456_v56 }
  0xe0   : > { %767 = vmatprep.mubr.bf16.mxu0 %v2457_v57 }
  0xe1   : > { %1450 = vmatpush1.bf16.msra.mxu0 %v2529_v21 }
  0xe2   : > { %1451 = vmatprep.subr.bf16.mxu0 %v2534_v22 }
  0xe5   : > { %1452 = vmatpush1.bf16.msra.mxu0 %v2532_v23 }
  0xe6   : > { %1453 = vmatprep.subr.bf16.mxu0 %v2537_v24 }
  0xe7   : > { %768 = vmatmul.mubr.bf16.gmra.mrb[8].mxu0 %v2459_v62 }
  0xe8   : > { %777 = vmatprep.mubr.bf16.mxu0 %v2460_v63 }
  0xe9   : > { %1454 = vmatpush1.bf16.msra.mxu0 %v2535_v25 }
  0xea   : > { %1455 = vmatprep.subr.bf16.mxu0 %v2540_v26 }
  0xed   : > { %1456 = vmatpush1.bf16.msra.mxu0 %v2538_v27 }
  0xee   : > { %1457 = vmatprep.subr.bf16.mxu0 %v2543_v28 }
  0xef   : > { %778 = vmatmul.mubr.bf16.gmra.mrb[12].mxu0 %v2462_v2 }
  0xf0   : > { %787 = vmatprep.mubr.bf16.mxu0 %v2463_v3 }
  0xf1   : > { %1458 = vmatpush1.bf16.msra.mxu0 %v2541_v29 }
  0xf2   : > { %1459 = vmatprep.subr.bf16.mxu0 %v2546_v30 }
  0xf5   : > { %1460 = vmatpush1.bf16.msra.mxu0 %v2544_v31 }
  0xf6   : > { %1461 = vmatprep.subr.bf16.mxu0 %v2549_v32 }
  0xf7   : > { %788 = vmatmul.mubr.bf16.gmra.mrb[16].mxu0 %v2465_v4 }
  0xf8   : > { %797 = vmatprep.mubr.bf16.mxu0 %v2466_v5 }
  0xf9   : > { %1462 = vmatpush1.bf16.msra.mxu0 %v2547_v33 }
  0xfa   : > { %1463 = vmatprep.subr.bf16.mxu0 %v2552_v34 }
  0xfd   : > { %1464 = vmatpush1.bf16.msra.mxu0 %v2550_v35 }
  0xfe   : > { %1465 = vmatprep.subr.bf16.mxu0 %v2555_v36 }
  0xff   : > { %798 = vmatmul.mubr.bf16.gmra.mrb[20].mxu0 %v2468_v6 }
 0x100   : > { %807 = vmatprep.mubr.bf16.mxu0 %v2469_v7 }
 0x101   : > { %1466 = vmatpush1.bf16.msra.mxu0 %v2553_v37 }
 0x102   : > { %1467 = vmatprep.subr.bf16.mxu0 %v2558_v38 }
 0x105   : > { %1468 = vmatpush1.bf16.msra.mxu0 %v2556_v39 }
 0x106   : > { %1469 = vmatprep.subr.bf16.mxu0 %v2561_v40 }
 0x107   : > { %808 = vmatmul.mubr.bf16.gmra.mrb[24].mxu0 %v2471_v8 }
 0x108   : > { %817 = vmatprep.mubr.bf16.mxu0 %v2472_v9 }
 0x109   : > { %1470 = vmatpush1.bf16.msra.mxu0 %v2559_v42 }
 0x10a   : > { %1471 = vmatprep.subr.bf16.mxu0 %v2564_v43 }
 0x10d   : > { %1472 = vmatpush1.bf16.msra.mxu0 %v2562_v45 }
 0x10f   : > { %818 = vmatmul.mubr.bf16.gmra.mrb[28].mxu0 %v2474_v10 }
 0x1aa   : > { %v749_v51 = vpop.f32.mrb[0].mxu0 }
 0x1ab   : > { %v750_v52 = vadd.f32 %v749_v51, %v3080_v49  ;;  %v751_v53 = vpop.f32.mrb[1].mxu0 }
 0x1ac   : > { %v752_v54 = vadd.f32 %v751_v53, %v3083_v50  ;;  %v753_v55 = vpop.f32.mrb[2].mxu0 }
 0x1ad   : > { %v754_v56 = vadd.f32 %v753_v55, %v3080_v49  ;;  %v755_v57 = vpop.f32.mrb[3].mxu0  ;;  %v828_v59 = vmax.f32 %v750_v52, 0.0 }
 0x1ae   : > { %v756_v58 = vadd.f32 %v755_v57, %v3083_v50  ;;  %v829_v61 = vmax.f32 %v752_v54, 0.0 }
 0x1af   : > { %v830_v60 = vmax.f32 %v754_v56, 0.0 }
 0x1b0   : > { %v831_v62 = vmax.f32 %v756_v58, 0.0 }
 0x1b1   : > { %v860_v63 = vpack.c.bf16 %v830_v60, %v828_v59 }
 0x1b2   : > { %v759_v0 = vpop.f32.mrb[4].mxu0  ;;  %v861_v1 = vpack.c.bf16 %v831_v62, %v829_v61 }
 0x1b3   : > { %v760_v2 = vadd.f32 %v759_v0, %v3080_v49  ;;  %v761_v3 = vpop.f32.mrb[5].mxu0 }
 0x1b4   : > { %v762_v4 = vadd.f32 %v761_v3, %v3083_v50  ;;  %v763_v5 = vpop.f32.mrb[6].mxu0  ;;  %1112 = vmatprep.mubr.bf16.mxu1 %v861_v1 }
 0x1b5   : > { %v764_v6 = vadd.f32 %v763_v5, %v3080_v49  ;;  %v765_v7 = vpop.f32.mrb[7].mxu0  ;;  %1113 = vmatmul.mubr.bf16.vlgmr.msra.gmra.mrb[0].mxu1 %v860_v63  ;;  %v832_v9 = vmax.f32 %v760_v2, 0.0 }
 0x1b6   : > { %v766_v8 = vadd.f32 %v765_v7, %v3083_v50  ;;  %v833_v11 = vmax.f32 %v762_v4, 0.0 }
 0x1b7   : > { %v834_v10 = vmax.f32 %v764_v6, 0.0 }
 0x1b8   : > { %v835_v12 = vmax.f32 %v766_v8, 0.0 }
 0x1b9   : > { %v862_v13 = vpack.c.bf16 %v834_v10, %v832_v9 }
 0x1ba   : > { %v863_v14 = vpack.c.bf16 %v835_v12, %v833_v11  ;;  %v769_v15 = vpop.f32.mrb[8].mxu0 }
 0x1bb   : > { %v770_v16 = vadd.f32 %v769_v15, %v3080_v49  ;;  %v771_v17 = vpop.f32.mrb[9].mxu0 }
 0x1bc   : > { %v772_v18 = vadd.f32 %v771_v17, %v3083_v50  ;;  %v773_v19 = vpop.f32.mrb[10].mxu0  ;;  %1122 = vmatprep.mubr.bf16.mxu1 %v863_v14 }
 0x1bd   : > { %v774_v20 = vadd.f32 %v773_v19, %v3080_v49  ;;  %v775_v21 = vpop.f32.mrb[11].mxu0  ;;  %1123 = vmatmul.mubr.bf16.gmra.mrb[4].mxu1 %v862_v13  ;;  %v836_v23 = vmax.f32 %v770_v16, 0.0 }
 0x1be   : > { %v776_v22 = vadd.f32 %v775_v21, %v3083_v50  ;;  %v837_v25 = vmax.f32 %v772_v18, 0.0 }
 0x1bf   : > { %v838_v24 = vmax.f32 %v774_v20, 0.0 }
 0x1c0   : > { %v839_v26 = vmax.f32 %v776_v22, 0.0 }
 0x1c1   : > { %v864_v27 = vpack.c.bf16 %v838_v24, %v836_v23 }
 0x1c2   : > { %v865_v28 = vpack.c.bf16 %v839_v26, %v837_v25  ;;  %v779_v29 = vpop.f32.mrb[12].mxu0 }
 0x1c3   : > { %v780_v30 = vadd.f32 %v779_v29, %v3080_v49  ;;  %v781_v31 = vpop.f32.mrb[13].mxu0 }
 0x1c4   : > { %v782_v32 = vadd.f32 %v781_v31, %v3083_v50  ;;  %v783_v33 = vpop.f32.mrb[14].mxu0  ;;  %1132 = vmatprep.mubr.bf16.mxu1 %v865_v28 }
 0x1c5   : > { %v784_v34 = vadd.f32 %v783_v33, %v3080_v49  ;;  %v785_v35 = vpop.f32.mrb[15].mxu0  ;;  %1133 = vmatmul.mubr.bf16.gmra.mrb[8].mxu1 %v864_v27  ;;  %v840_v37 = vmax.f32 %v780_v30, 0.0 }
 0x1c6   : > { %v786_v36 = vadd.f32 %v785_v35, %v3083_v50  ;;  %v841_v39 = vmax.f32 %v782_v32, 0.0 }
 0x1c7   : > { %v842_v38 = vmax.f32 %v784_v34, 0.0 }
 0x1c8   : > { %v843_v40 = vmax.f32 %v786_v36, 0.0 }
 0x1c9   : > { %v866_v41 = vpack.c.bf16 %v842_v38, %v840_v37 }
 0x1ca   : > { %v867_v42 = vpack.c.bf16 %v843_v40, %v841_v39  ;;  %v789_v43 = vpop.f32.mrb[16].mxu0  ;;  %v2567_v39 = vld [vmem:[#allocation7 + $0xe4] ss:$8 sps:$4 sm:$0xff]   ;;  %v2565_v40 = vld [vmem:[#allocation7 + $0xe0] ss:$8 sps:$4 sm:$0xff]  }
 0x1cb   : > { %v790_v44 = vadd.f32 %v789_v43, %v3080_v49  ;;  %v791_v45 = vpop.f32.mrb[17].mxu0  ;;  %1473 = vmatprep.subr.bf16.mxu0 %v2567_v39  ;;  %v2572_v43 = vld [vmem:[#allocation9] sm:$0xff]  }
 0x1cc   : > { %v792_v47 = vadd.f32 %v791_v45, %v3083_v50  ;;  %v793_v51 = vpop.f32.mrb[18].mxu0  ;;  %1142 = vmatprep.mubr.bf16.mxu1 %v867_v42  ;;  %1474 = vmatpush1.bf16.msra.mxu0 %v2565_v40  ;;  %v2568_v42 = vld [vmem:[#allocation7 + $0xf0] ss:$8 sps:$4 sm:$0xff]  }
 0x1cd   : > { %v794_v52 = vadd.f32 %v793_v51, %v3080_v49  ;;  %v795_v53 = vpop.f32.mrb[19].mxu0  ;;  %1143 = vmatmul.mubr.bf16.gmra.mrb[12].mxu1 %v866_v41  ;;  %v844_v55 = vmax.f32 %v790_v44, 0.0  ;;  %v2570_v41 = vld [vmem:[#allocation7 + $0xf4] ss:$8 sps:$4 sm:$0xff]   ;;  %v2573_v44 = vld [vmem:[#allocation9 + $0x48] sm:$0xff]  }
 0x1ce   : > { %v796_v54 = vadd.f32 %v795_v53, %v3083_v50  ;;  %v845_v57 = vmax.f32 %v792_v47, 0.0  ;;  %1475 = vmatprep.subr.bf16.mxu0 %v2570_v41  ;;  %v2575_v45 = vld [vmem:[#allocation9 + $0x50] sm:$0xff]   ;;  %v2577_v51 = vld [vmem:[#allocation9 + $0x58] sm:$0xff]   ;;  %v2579_v53 = vld [vmem:[#allocation9 + $0x60] sm:$0xff]  }
 0x1cf   : > { %v846_v56 = vmax.f32 %v794_v52, 0.0  ;;  %v2576_v47 = vld [vmem:[#allocation9 + $0x10] sm:$0xff]   ;;  %v2578_v52 = vld [vmem:[#allocation9 + $0x18] sm:$0xff]  }
 0x1d0   : > { %v847_v58 = vmax.f32 %v796_v54, 0.0  ;;  %1476 = vmatpush1.bf16.msra.mxu0 %v2568_v42  ;;  %v2580_v54 = vld [vmem:[#allocation9 + $0x20] sm:$0xff]  }
 0x1d1   : > { %v868_v59 = vpack.c.bf16 %v846_v56, %v844_v55  ;;  %v2581_v55 = vld [vmem:[#allocation9 + $0x68] sm:$0xff]  }
 0x1d2   : > { %v869_v60 = vpack.c.bf16 %v847_v58, %v845_v57  ;;  %v799_v61 = vpop.f32.mrb[20].mxu0  ;;  %v2582_v56 = vld [vmem:[#allocation9 + $0x28] sm:$0xff]   ;;  %v2583_v57 = vld [vmem:[#allocation9 + $0x70] sm:$0xff]  }
 0x1d3   : > { %v800_v62 = vadd.f32 %v799_v61, %v3080_v49  ;;  %v801_v63 = vpop.f32.mrb[21].mxu0  ;;  %v2584_v58 = vld [vmem:[#allocation9 + $0x30] sm:$0xff]  }
 0x1d4   : > { %v802_v0 = vadd.f32 %v801_v63, %v3083_v50  ;;  %v803_v1 = vpop.f32.mrb[22].mxu0  ;;  %1152 = vmatprep.mubr.bf16.mxu1 %v869_v60 }
 0x1d5   : > { %v804_v2 = vadd.f32 %v803_v1, %v3080_v49  ;;  %v805_v3 = vpop.f32.mrb[23].mxu0  ;;  %1153 = vmatmul.mubr.bf16.gmra.mrb[16].mxu1 %v868_v59  ;;  %v848_v5 = vmax.f32 %v800_v62, 0.0  ;;  %v908_v59 = vld [vmem:[%s3252_s4] sm:$0x3] }
 0x1d6   : > { %v806_v4 = vadd.f32 %v805_v3, %v3083_v50  ;;  %v849_v7 = vmax.f32 %v802_v0, 0.0  ;;  %v3121_v60 = vrot.slane %v908_v59, %v3072_v46  ;;  %v3124_v61 = vrot.slane %v908_v59, %v3077_v48 }
 0x1d7   : > { %v850_v6 = vmax.f32 %v804_v2, 0.0 }
 0x1d8   : > { %v851_v8 = vmax.f32 %v806_v4, 0.0 }
 0x1d9   : > { %v870_v9 = vpack.c.bf16 %v850_v6, %v848_v5 }
 0x1da   : > { %v871_v10 = vpack.c.bf16 %v851_v8, %v849_v7  ;;  %v809_v11 = vpop.f32.mrb[24].mxu0 }
 0x1db   : > { %v810_v12 = vadd.f32 %v809_v11, %v3080_v49  ;;  %v811_v13 = vpop.f32.mrb[25].mxu0 }
 0x1dc   : > { %v812_v14 = vadd.f32 %v811_v13, %v3083_v50  ;;  %v813_v15 = vpop.f32.mrb[26].mxu0  ;;  %1162 = vmatprep.mubr.bf16.mxu1 %v871_v10 }
 0x1dd   : > { %v814_v16 = vadd.f32 %v813_v15, %v3080_v49  ;;  %v815_v17 = vpop.f32.mrb[27].mxu0  ;;  %1163 = vmatmul.mubr.bf16.gmra.mrb[20].mxu1 %v870_v9  ;;  %v852_v19 = vmax.f32 %v810_v12, 0.0 }
 0x1de   : > { %v816_v18 = vadd.f32 %v815_v17, %v3083_v50  ;;  %v853_v21 = vmax.f32 %v812_v14, 0.0 }
 0x1df   : > { %v854_v20 = vmax.f32 %v814_v16, 0.0 }
 0x1e0   : > { %v855_v22 = vmax.f32 %v816_v18, 0.0 }
 0x1e1   : > { %v872_v23 = vpack.c.bf16 %v854_v20, %v852_v19 }
 0x1e2   : > { %v873_v24 = vpack.c.bf16 %v855_v22, %v853_v21  ;;  %v819_v25 = vpop.f32.mrb[28].mxu0 }
 0x1e3   : > { %v820_v26 = vadd.f32 %v819_v25, %v3080_v49  ;;  %v821_v27 = vpop.f32.mrb[29].mxu0 }
 0x1e4   : > { %v822_v28 = vadd.f32 %v821_v27, %v3083_v50  ;;  %v823_v29 = vpop.f32.mrb[30].mxu0  ;;  %1172 = vmatprep.mubr.bf16.mxu1 %v873_v24 }
 0x1e5   : > { %v824_v30 = vadd.f32 %v823_v29, %v3080_v49  ;;  %v825_v31 = vpop.f32.mrb[31].mxu0  ;;  %1173 = vmatmul.mubr.bf16.gmra.mrb[24].mxu1 %v872_v23  ;;  %v856_v33 = vmax.f32 %v820_v26, 0.0  ;;  %v2571_v49 = vld [vmem:[#allocation9 + $0x40] sm:$0xff]  }
 0x1e6   : > { %v826_v32 = vadd.f32 %v825_v31, %v3083_v50  ;;  %v857_v35 = vmax.f32 %v822_v28, 0.0  ;;  %2255 = vmatprep.subr.bf16.mxu1 %v2571_v49  ;;  %v2574_v50 = vld [vmem:[#allocation9 + $0x8] sm:$0xff]  }
 0x1e7   : > { %v858_v34 = vmax.f32 %v824_v30, 0.0  ;;  %2256 = vmatpush3.bf16.msra.mxu1 %v2572_v43 }
 0x1e8   : > { %v859_v36 = vmax.f32 %v826_v32, 0.0  ;;  %2257 = vmatprep.subr.bf16.mxu1 %v2573_v44 }
 0x1e9   : > { %v874_v37 = vpack.c.bf16 %v858_v34, %v856_v33 }
 0x1ea   : > { %v875_v38 = vpack.c.bf16 %v859_v36, %v857_v35 }
 0x1eb   : > { %2258 = vmatpush3.bf16.msra.mxu1 %v2574_v50 }
 0x1ec   : > { %1182 = vmatprep.mubr.bf16.mxu1 %v875_v38  ;;  %2259 = vmatprep.subr.bf16.mxu1 %v2575_v45 }
 0x1ed   : > { %1183 = vmatmul.mubr.bf16.gmra.mrb[28].mxu1 %v874_v37 }
 0x1ef   : > { %2260 = vmatpush3.bf16.msra.mxu1 %v2576_v47 }
 0x1f0   : > { %2261 = vmatprep.subr.bf16.mxu1 %v2577_v51 }
 0x1f3   : > { %2262 = vmatpush3.bf16.msra.mxu1 %v2578_v52 }
 0x1f4   : > { %2263 = vmatprep.subr.bf16.mxu1 %v2579_v53 }
 0x1f7   : > { %2264 = vmatpush3.bf16.msra.mxu1 %v2580_v54 }
 0x1f8   : > { %2265 = vmatprep.subr.bf16.mxu1 %v2581_v55 }
 0x1fb   : > { %2266 = vmatpush3.bf16.msra.mxu1 %v2582_v56 }
 0x1fc   : > { %2267 = vmatprep.subr.bf16.mxu1 %v2583_v57 }
 0x1ff   : > { %2268 = vmatpush3.bf16.msra.mxu1 %v2584_v58 }
 0x288   : > { %v1114_v62 = vpop.f32.mrb[0].mxu1 }
 0x289   : > { %v1115_v63 = vadd.f32 %v1114_v62, %v3121_v60  ;;  %v1116_v0 = vpop.f32.mrb[1].mxu1 }
 0x28a   : > { %v1117_v1 = vadd.f32 %v1116_v0, %v3124_v61  ;;  %v1118_v2 = vpop.f32.mrb[2].mxu1 }
 0x28b   : > { %v1119_v3 = vadd.f32 %v1118_v2, %v3121_v60  ;;  %v1120_v4 = vpop.f32.mrb[3].mxu1  ;;  %v1193_v6 = vmax.f32 %v1115_v63, 0.0 }
 0x28c   : > { %v1121_v5 = vadd.f32 %v1120_v4, %v3124_v61  ;;  %v1194_v8 = vmax.f32 %v1117_v1, 0.0 }
 0x28d   : > { %v1195_v7 = vmax.f32 %v1119_v3, 0.0 }
 0x28e   : > { %v1196_v9 = vmax.f32 %v1121_v5, 0.0 }
 0x28f   : > { %v1225_v10 = vpack.c.bf16 %v1195_v7, %v1193_v6 }
 0x290   : > { %v1226_v11 = vpack.c.bf16 %v1196_v9, %v1194_v8  ;;  %v1124_v12 = vpop.f32.mrb[4].mxu1 }
 0x291   : > { %v1125_v13 = vadd.f32 %v1124_v12, %v3121_v60  ;;  %v1126_v14 = vpop.f32.mrb[5].mxu1 }
 0x292   : > { %v1127_v15 = vadd.f32 %v1126_v14, %v3124_v61  ;;  %v1128_v16 = vpop.f32.mrb[6].mxu1  ;;  %1477 = vmatprep.mubr.bf16.mxu0 %v1226_v11 }
 0x293   : > { %v1129_v17 = vadd.f32 %v1128_v16, %v3121_v60  ;;  %v1130_v18 = vpop.f32.mrb[7].mxu1  ;;  %1478 = vmatmul.mubr.bf16.vlgmr.msra.gmra.mrb[32].mxu0 %v1225_v10  ;;  %v1197_v20 = vmax.f32 %v1125_v13, 0.0 }
 0x294   : > { %v1131_v19 = vadd.f32 %v1130_v18, %v3124_v61  ;;  %v1198_v22 = vmax.f32 %v1127_v15, 0.0 }
 0x295   : > { %v1199_v21 = vmax.f32 %v1129_v17, 0.0 }
 0x296   : > { %v1200_v23 = vmax.f32 %v1131_v19, 0.0 }
 0x297   : > { %v1227_v24 = vpack.c.bf16 %v1199_v21, %v1197_v20 }
 0x298   : > { %v1228_v25 = vpack.c.bf16 %v1200_v23, %v1198_v22  ;;  %v1134_v26 = vpop.f32.mrb[8].mxu1 }
 0x299   : > { %v1135_v27 = vadd.f32 %v1134_v26, %v3121_v60  ;;  %v1136_v28 = vpop.f32.mrb[9].mxu1 }
 0x29a   : > { %v1137_v29 = vadd.f32 %v1136_v28, %v3124_v61  ;;  %v1138_v30 = vpop.f32.mrb[10].mxu1  ;;  %1487 = vmatprep.mubr.bf16.mxu0 %v1228_v25 }
 0x29b   : > { %v1139_v31 = vadd.f32 %v1138_v30, %v3121_v60  ;;  %v1140_v32 = vpop.f32.mrb[11].mxu1  ;;  %1488 = vmatmul.mubr.bf16.gmra.mrb[36].mxu0 %v1227_v24  ;;  %v1201_v34 = vmax.f32 %v1135_v27, 0.0 }
 0x29c   : > { %v1141_v33 = vadd.f32 %v1140_v32, %v3124_v61  ;;  %v1202_v36 = vmax.f32 %v1137_v29, 0.0 }
 0x29d   : > { %v1203_v35 = vmax.f32 %v1139_v31, 0.0 }
 0x29e   : > { %v1204_v37 = vmax.f32 %v1141_v33, 0.0 }
 0x29f   : > { %v1229_v38 = vpack.c.bf16 %v1203_v35, %v1201_v34 }
 0x2a0   : > { %v1230_v39 = vpack.c.bf16 %v1204_v37, %v1202_v36  ;;  %v1144_v40 = vpop.f32.mrb[12].mxu1 }
 0x2a1   : > { %v1145_v41 = vadd.f32 %v1144_v40, %v3121_v60  ;;  %v1146_v42 = vpop.f32.mrb[13].mxu1 }
 0x2a2   : > { %v1147_v49 = vadd.f32 %v1146_v42, %v3124_v61  ;;  %v1148_v43 = vpop.f32.mrb[14].mxu1  ;;  %1497 = vmatprep.mubr.bf16.mxu0 %v1230_v39 }
 0x2a3   : > { %v1149_v44 = vadd.f32 %v1148_v43, %v3121_v60  ;;  %v1150_v50 = vpop.f32.mrb[15].mxu1  ;;  %1498 = vmatmul.mubr.bf16.gmra.mrb[40].mxu0 %v1229_v38  ;;  %v1205_v47 = vmax.f32 %v1145_v41, 0.0 }
 0x2a4   : > { %v1151_v45 = vadd.f32 %v1150_v50, %v3124_v61  ;;  %v1206_v52 = vmax.f32 %v1147_v49, 0.0 }
 0x2a5   : > { %v1207_v51 = vmax.f32 %v1149_v44, 0.0 }
 0x2a6   : > { %v1208_v53 = vmax.f32 %v1151_v45, 0.0 }
 0x2a7   : > { %v1231_v54 = vpack.c.bf16 %v1207_v51, %v1205_v47 }
 0x2a8   : > { %v1232_v55 = vpack.c.bf16 %v1208_v53, %v1206_v52  ;;  %v1154_v56 = vpop.f32.mrb[16].mxu1  ;;  %v2585_v52 = vld [vmem:[#allocation9 + $0x78] sm:$0xff]  }
 0x2a9   : > { %v1155_v57 = vadd.f32 %v1154_v56, %v3121_v60  ;;  %v1156_v58 = vpop.f32.mrb[17].mxu1  ;;  %v2586_v53 = vld [vmem:[#allocation9 + $0x38] sm:$0xff]   ;;  %2269 = vmatprep.subr.bf16.mxu1 %v2585_v52 }
 0x2aa   : > { %v1157_v59 = vadd.f32 %v1156_v58, %v3124_v61  ;;  %v1158_v62 = vpop.f32.mrb[18].mxu1  ;;  %1507 = vmatprep.mubr.bf16.mxu0 %v1232_v55  ;;  %2270 = vmatpush3.bf16.msra.mxu1 %v2586_v53 }
 0x2ab   : > { %v1159_v63 = vadd.f32 %v1158_v62, %v3121_v60  ;;  %v1160_v0 = vpop.f32.mrb[19].mxu1  ;;  %1508 = vmatmul.mubr.bf16.gmra.mrb[44].mxu0 %v1231_v54  ;;  %v1209_v2 = vmax.f32 %v1155_v57, 0.0 }
 0x2ac   : > { %v1161_v1 = vadd.f32 %v1160_v0, %v3124_v61  ;;  %v1210_v4 = vmax.f32 %v1157_v59, 0.0 }
 0x2ad   : > { %v1211_v3 = vmax.f32 %v1159_v63, 0.0 }
 0x2ae   : > { %v1212_v5 = vmax.f32 %v1161_v1, 0.0 }
 0x2af   : > { %v1233_v6 = vpack.c.bf16 %v1211_v3, %v1209_v2 }
 0x2b0   : > { %v1234_v7 = vpack.c.bf16 %v1212_v5, %v1210_v4  ;;  %v1164_v8 = vpop.f32.mrb[20].mxu1 }
 0x2b1   : > { %v1165_v9 = vadd.f32 %v1164_v8, %v3121_v60  ;;  %v1166_v10 = vpop.f32.mrb[21].mxu1 }
 0x2b2   : > { %v1167_v11 = vadd.f32 %v1166_v10, %v3124_v61  ;;  %v1168_v12 = vpop.f32.mrb[22].mxu1  ;;  %1517 = vmatprep.mubr.bf16.mxu0 %v1234_v7 }
 0x2b3   : > { %v1169_v13 = vadd.f32 %v1168_v12, %v3121_v60  ;;  %v1170_v14 = vpop.f32.mrb[23].mxu1  ;;  %1518 = vmatmul.mubr.bf16.gmra.mrb[48].mxu0 %v1233_v6  ;;  %v1213_v16 = vmax.f32 %v1165_v9, 0.0 }
 0x2b4   : > { %v1171_v15 = vadd.f32 %v1170_v14, %v3124_v61  ;;  %v1214_v18 = vmax.f32 %v1167_v11, 0.0 }
 0x2b5   : > { %v1215_v17 = vmax.f32 %v1169_v13, 0.0 }
 0x2b6   : > { %v1216_v19 = vmax.f32 %v1171_v15, 0.0 }
 0x2b7   : > { %v1235_v20 = vpack.c.bf16 %v1215_v17, %v1213_v16 }
 0x2b8   : > { %v1236_v21 = vpack.c.bf16 %v1216_v19, %v1214_v18  ;;  %v1174_v22 = vpop.f32.mrb[24].mxu1 }
 0x2b9   : > { %v1175_v23 = vadd.f32 %v1174_v22, %v3121_v60  ;;  %v1176_v24 = vpop.f32.mrb[25].mxu1 }
 0x2ba   : > { %v1177_v25 = vadd.f32 %v1176_v24, %v3124_v61  ;;  %v1178_v26 = vpop.f32.mrb[26].mxu1  ;;  %1527 = vmatprep.mubr.bf16.mxu0 %v1236_v21 }
 0x2bb   : > { %v1179_v27 = vadd.f32 %v1178_v26, %v3121_v60  ;;  %v1180_v28 = vpop.f32.mrb[27].mxu1  ;;  %1528 = vmatmul.mubr.bf16.gmra.mrb[52].mxu0 %v1235_v20  ;;  %v1217_v30 = vmax.f32 %v1175_v23, 0.0 }
 0x2bc   : > { %v1181_v29 = vadd.f32 %v1180_v28, %v3124_v61  ;;  %v1218_v32 = vmax.f32 %v1177_v25, 0.0 }
 0x2bd   : > { %v1219_v31 = vmax.f32 %v1179_v27, 0.0 }
 0x2be   : > { %v1220_v33 = vmax.f32 %v1181_v29, 0.0 }
 0x2bf   : > { %v1237_v34 = vpack.c.bf16 %v1219_v31, %v1217_v30 }
 0x2c0   : > { %v1238_v35 = vpack.c.bf16 %v1220_v33, %v1218_v32  ;;  %v1184_v36 = vpop.f32.mrb[28].mxu1 }
 0x2c1   : > { %v1185_v37 = vadd.f32 %v1184_v36, %v3121_v60  ;;  %v1186_v38 = vpop.f32.mrb[29].mxu1 }
 0x2c2   : > { %v1187_v39 = vadd.f32 %v1186_v38, %v3124_v61  ;;  %v1188_v40 = vpop.f32.mrb[30].mxu1  ;;  %1537 = vmatprep.mubr.bf16.mxu0 %v1238_v35 }
 0x2c3   : > { %v1189_v41 = vadd.f32 %v1188_v40, %v3121_v60  ;;  %v1190_v42 = vpop.f32.mrb[31].mxu1  ;;  %1538 = vmatmul.mubr.bf16.gmra.mrb[56].mxu0 %v1237_v34  ;;  %v1221_v43 = vmax.f32 %v1185_v37, 0.0  ;;  %v1273_v60 = vld [vmem:[%s3254_s6] sm:$0x3] }
 0x2c4   : > { %v1191_v49 = vadd.f32 %v1190_v42, %v3124_v61  ;;  %v1222_v50 = vmax.f32 %v1187_v39, 0.0  ;;  %v3162_v54 = vrot.slane %v1273_v60, %v3072_v46  ;;  %v3165_v61 = vrot.slane %v1273_v60, %v3077_v48 }
 0x2c5   : > { %v1223_v44 = vmax.f32 %v1189_v41, 0.0 }
 0x2c6   : > { %v1224_v45 = vmax.f32 %v1191_v49, 0.0 }
 0x2c7   : > { %v1239_v47 = vpack.c.bf16 %v1223_v44, %v1221_v43 }
 0x2c8   : > { %v1240_v51 = vpack.c.bf16 %v1224_v45, %v1222_v50 }
 0x2ca   : > { %1547 = vmatprep.mubr.bf16.mxu0 %v1240_v51 }
 0x2cb   : > { %1548 = vmatmul.mubr.bf16.gmra.mrb[60].mxu0 %v1239_v47 }
 0x366   : > { %v1479_v55 = vpop.f32.mrb[32].mxu0 }
 0x367   : > { %v1480_v56 = vadd.f32 %v1479_v55, %v3162_v54  ;;  %v1481_v57 = vpop.f32.mrb[33].mxu0 }
 0x368   : > { %v1482_v58 = vadd.f32 %v1481_v57, %v3165_v61  ;;  %v1483_v59 = vpop.f32.mrb[34].mxu0 }
 0x369   : > { %v1484_v62 = vadd.f32 %v1483_v59, %v3162_v54  ;;  %v1485_v63 = vpop.f32.mrb[35].mxu0  ;;  %v1558_v1 = vmax.f32 %v1480_v56, 0.0 }
 0x36a   : > { %v1486_v0 = vadd.f32 %v1485_v63, %v3165_v61  ;;  %v1559_v3 = vmax.f32 %v1482_v58, 0.0 }
 0x36b   : > { %v1560_v2 = vmax.f32 %v1484_v62, 0.0 }
 0x36c   : > { %v1561_v46 = vmax.f32 %v1486_v0, 0.0 }
 0x36d   : > { %v1590_v4 = vpack.c.bf16 %v1560_v2, %v1558_v1 }
 0x36e   : > { %v1591_v5 = vpack.c.bf16 %v1561_v46, %v1559_v3  ;;  %v1489_v48 = vpop.f32.mrb[36].mxu0 }
 0x36f   : > { %v1490_v6 = vadd.f32 %v1489_v48, %v3162_v54  ;;  %v1491_v7 = vpop.f32.mrb[37].mxu0 }
 0x370   : > { %v1492_v8 = vadd.f32 %v1491_v7, %v3165_v61  ;;  %v1493_v9 = vpop.f32.mrb[38].mxu0  ;;  %1773 = vmatprep.mubr.bf16.mxu1 %v1591_v5 }
 0x371   : > { %v1494_v10 = vadd.f32 %v1493_v9, %v3162_v54  ;;  %v1495_v11 = vpop.f32.mrb[39].mxu0  ;;  %1774 = vmatmul.mubr.bf16.vlgmr.msra.gmra.mrb[32].mxu1 %v1590_v4  ;;  %v1562_v13 = vmax.f32 %v1490_v6, 0.0 }
 0x372   : > { %v1496_v12 = vadd.f32 %v1495_v11, %v3165_v61  ;;  %v1563_v15 = vmax.f32 %v1492_v8, 0.0 }
 0x373   : > { %v1564_v14 = vmax.f32 %v1494_v10, 0.0 }
 0x374   : > { %v1565_v16 = vmax.f32 %v1496_v12, 0.0 }
 0x375   : > { %v1592_v17 = vpack.c.bf16 %v1564_v14, %v1562_v13 }
 0x376   : > { %v1593_v18 = vpack.c.bf16 %v1565_v16, %v1563_v15  ;;  %v1499_v19 = vpop.f32.mrb[40].mxu0 }
 0x377   : > { %v1500_v20 = vadd.f32 %v1499_v19, %v3162_v54  ;;  %v1501_v21 = vpop.f32.mrb[41].mxu0 }
 0x378   : > { %v1502_v22 = vadd.f32 %v1501_v21, %v3165_v61  ;;  %v1503_v23 = vpop.f32.mrb[42].mxu0  ;;  %1781 = vmatprep.mubr.bf16.mxu1 %v1593_v18 }
 0x379   : > { %v1504_v24 = vadd.f32 %v1503_v23, %v3162_v54  ;;  %v1505_v25 = vpop.f32.mrb[43].mxu0  ;;  %1782 = vmatmul.mubr.bf16.gmra.mrb[36].mxu1 %v1592_v17  ;;  %v1566_v27 = vmax.f32 %v1500_v20, 0.0 }
 0x37a   : > { %v1506_v26 = vadd.f32 %v1505_v25, %v3165_v61  ;;  %v1567_v29 = vmax.f32 %v1502_v22, 0.0 }
 0x37b   : > { %v1568_v28 = vmax.f32 %v1504_v24, 0.0 }
 0x37c   : > { %v1569_v30 = vmax.f32 %v1506_v26, 0.0 }
 0x37d   : > { %v1594_v31 = vpack.c.bf16 %v1568_v28, %v1566_v27 }
 0x37e   : > { %v1595_v32 = vpack.c.bf16 %v1569_v30, %v1567_v29  ;;  %v1509_v33 = vpop.f32.mrb[44].mxu0 }
 0x37f   : > { %v1510_v34 = vadd.f32 %v1509_v33, %v3162_v54  ;;  %v1511_v35 = vpop.f32.mrb[45].mxu0 }
 0x380   : > { %v1512_v36 = vadd.f32 %v1511_v35, %v3165_v61  ;;  %v1513_v37 = vpop.f32.mrb[46].mxu0  ;;  %1789 = vmatprep.mubr.bf16.mxu1 %v1595_v32 }
 0x381   : > { %v1514_v38 = vadd.f32 %v1513_v37, %v3162_v54  ;;  %v1515_v39 = vpop.f32.mrb[47].mxu0  ;;  %1790 = vmatmul.mubr.bf16.gmra.mrb[40].mxu1 %v1594_v31  ;;  %v1570_v41 = vmax.f32 %v1510_v34, 0.0 }
 0x382   : > { %v1516_v40 = vadd.f32 %v1515_v39, %v3165_v61  ;;  %v1571_v49 = vmax.f32 %v1512_v36, 0.0 }
 0x383   : > { %v1572_v42 = vmax.f32 %v1514_v38, 0.0 }
 0x384   : > { %v1573_v43 = vmax.f32 %v1516_v40, 0.0 }
 0x385   : > { %v1596_v44 = vpack.c.bf16 %v1572_v42, %v1570_v41 }
 0x386   : > { %v1597_v50 = vpack.c.bf16 %v1573_v43, %v1571_v49  ;;  %v1519_v45 = vpop.f32.mrb[48].mxu0 }
 0x387   : > { %v1520_v47 = vadd.f32 %v1519_v45, %v3162_v54  ;;  %v1521_v51 = vpop.f32.mrb[49].mxu0 }
 0x388   : > { %v1522_v52 = vadd.f32 %v1521_v51, %v3165_v61  ;;  %v1523_v53 = vpop.f32.mrb[50].mxu0  ;;  %1797 = vmatprep.mubr.bf16.mxu1 %v1597_v50 }
 0x389   : > { %v1524_v60 = vadd.f32 %v1523_v53, %v3162_v54  ;;  %v1525_v55 = vpop.f32.mrb[51].mxu0  ;;  %1798 = vmatmul.mubr.bf16.gmra.mrb[44].mxu1 %v1596_v44  ;;  %v1574_v57 = vmax.f32 %v1520_v47, 0.0 }
 0x38a   : > { %v1526_v56 = vadd.f32 %v1525_v55, %v3165_v61  ;;  %v1575_v59 = vmax.f32 %v1522_v52, 0.0 }
 0x38b   : > { %v1576_v58 = vmax.f32 %v1524_v60, 0.0 }
 0x38c   : > { %v1577_v62 = vmax.f32 %v1526_v56, 0.0 }
 0x38d   : > { %v1598_v63 = vpack.c.bf16 %v1576_v58, %v1574_v57 }
 0x38e   : > { %v1599_v0 = vpack.c.bf16 %v1577_v62, %v1575_v59  ;;  %v1529_v1 = vpop.f32.mrb[52].mxu0 }
 0x38f   : > { %v1530_v2 = vadd.f32 %v1529_v1, %v3162_v54  ;;  %v1531_v3 = vpop.f32.mrb[53].mxu0 }
 0x390   : > { %v1532_v46 = vadd.f32 %v1531_v3, %v3165_v61  ;;  %v1533_v4 = vpop.f32.mrb[54].mxu0  ;;  %1805 = vmatprep.mubr.bf16.mxu1 %v1599_v0 }
 0x391   : > { %v1534_v5 = vadd.f32 %v1533_v4, %v3162_v54  ;;  %v1535_v48 = vpop.f32.mrb[55].mxu0  ;;  %1806 = vmatmul.mubr.bf16.gmra.mrb[48].mxu1 %v1598_v63  ;;  %v1578_v7 = vmax.f32 %v1530_v2, 0.0 }
 0x392   : > { %v1536_v6 = vadd.f32 %v1535_v48, %v3165_v61  ;;  %v1579_v9 = vmax.f32 %v1532_v46, 0.0 }
 0x393   : > { %v1580_v8 = vmax.f32 %v1534_v5, 0.0 }
 0x394   : > { %v1581_v10 = vmax.f32 %v1536_v6, 0.0 }
 0x395   : > { %v1600_v11 = vpack.c.bf16 %v1580_v8, %v1578_v7 }
 0x396   : > { %v1601_v12 = vpack.c.bf16 %v1581_v10, %v1579_v9  ;;  %v1539_v13 = vpop.f32.mrb[56].mxu0 }
 0x397   : > { %v1540_v14 = vadd.f32 %v1539_v13, %v3162_v54  ;;  %v1541_v15 = vpop.f32.mrb[57].mxu0 }
 0x398   : > { %v1542_v16 = vadd.f32 %v1541_v15, %v3165_v61  ;;  %v1543_v17 = vpop.f32.mrb[58].mxu0  ;;  %1813 = vmatprep.mubr.bf16.mxu1 %v1601_v12 }
 0x399   : > { %v1544_v18 = vadd.f32 %v1543_v17, %v3162_v54  ;;  %v1545_v19 = vpop.f32.mrb[59].mxu0  ;;  %1814 = vmatmul.mubr.bf16.gmra.mrb[52].mxu1 %v1600_v11  ;;  %v1582_v21 = vmax.f32 %v1540_v14, 0.0 }
 0x39a   : > { %v1546_v20 = vadd.f32 %v1545_v19, %v3165_v61  ;;  %v1583_v23 = vmax.f32 %v1542_v16, 0.0 }
 0x39b   : > { %v1584_v22 = vmax.f32 %v1544_v18, 0.0 }
 0x39c   : > { %v1585_v24 = vmax.f32 %v1546_v20, 0.0 }
 0x39d   : > { %v1602_v25 = vpack.c.bf16 %v1584_v22, %v1582_v21 }
 0x39e   : > { %v1603_v26 = vpack.c.bf16 %v1585_v24, %v1583_v23  ;;  %v1549_v27 = vpop.f32.mrb[60].mxu0 }
 0x39f   : > { %v1550_v28 = vadd.f32 %v1549_v27, %v3162_v54  ;;  %v1551_v29 = vpop.f32.mrb[61].mxu0 }
 0x3a0   : > { %v1552_v30 = vadd.f32 %v1551_v29, %v3165_v61  ;;  %v1553_v31 = vpop.f32.mrb[62].mxu0  ;;  %1821 = vmatprep.mubr.bf16.mxu1 %v1603_v26 }
 0x3a1   : > { %v1554_v32 = vadd.f32 %v1553_v31, %v3162_v54  ;;  %v1555_v33 = vpop.f32.mrb[63].mxu0  ;;  %1822 = vmatmul.mubr.bf16.gmra.mrb[56].mxu1 %v1602_v25  ;;  %v1586_v35 = vmax.f32 %v1550_v28, 0.0 }
 0x3a2   : > { %v1556_v34 = vadd.f32 %v1555_v33, %v3165_v61  ;;  %v1587_v37 = vmax.f32 %v1552_v30, 0.0  ;;  %v3204_v61 = vld [vmem:[%s3256_s8] ss:$0 sm:$0xff] }
 0x3a3   : > { %v1588_v36 = vmax.f32 %v1554_v32, 0.0 }
 0x3a4   : > { %v1589_v38 = vmax.f32 %v1556_v34, 0.0 }
 0x3a5   : > { %v1604_v39 = vpack.c.bf16 %v1588_v36, %v1586_v35 }
 0x3a6   : > { %v1605_v40 = vpack.c.bf16 %v1589_v38, %v1587_v37 }
 0x3a8   : > { %1829 = vmatprep.mubr.bf16.mxu1 %v1605_v40 }
 0x3a9   : > { %1830 = vmatmul.mubr.bf16.gmra.mrb[60].mxu1 %v1604_v39 }
 0x444   : > { %v2271_v41 = vpop.f32.mrb[32].mxu1 }
 0x445   : > { %v2272_v42 = vpop.f32.mrb[33].mxu1 }
 0x446   : > { %v2273_v49 = vadd.f32 %v2272_v42, %v2271_v41  ;;  %v2274_v54 = vpop.f32.mrb[34].mxu1 }
 0x447   : > { %v2275_v43 = vpop.f32.mrb[35].mxu1 }
 0x448   : > { %v2276_v44 = vadd.f32 %v2275_v43, %v2274_v54  ;;  %v1776_v50 = vadd.f32 %v2273_v49, %v3204_v61 }
 0x44a   : > { %v1779_v45 = vadd.f32 %v2276_v44, %v3204_v61 }
 0x44c   : > { %v2211_v47 = vpack.c.bf16 %v1779_v45, %v1776_v50  ;;  %v2277_v51 = vpop.f32.mrb[36].mxu1 }
 0x44d   : > { %v2278_v52 = vpop.f32.mrb[37].mxu1 }
 0x44e   : > { %2212 = vst [vmem:[%s3211_s27] sm:$0xff] %v2211_v47   ;;  %v2279_v53 = vadd.f32 %v2278_v52, %v2277_v51  ;;  %v2280_v60 = vpop.f32.mrb[38].mxu1 }
 0x44f   : > { %v2281_v55 = vpop.f32.mrb[39].mxu1 }
 0x450   : > { %v2282_v56 = vadd.f32 %v2281_v55, %v2280_v60  ;;  %v1784_v57 = vadd.f32 %v2279_v53, %v3204_v61 }
 0x452   : > { %v1787_v58 = vadd.f32 %v2282_v56, %v3204_v61 }
 0x454   : > { %v2216_v59 = vpack.c.bf16 %v1787_v58, %v1784_v57  ;;  %v2283_v62 = vpop.f32.mrb[40].mxu1 }
 0x455   : > { %v2284_v63 = vpop.f32.mrb[41].mxu1 }
 0x456   : > { %2248 = vst [vmem:[%s3211_s27 + $0x8] sm:$0xff] %v2216_v59   ;;  %v2285_v0 = vadd.f32 %v2284_v63, %v2283_v62  ;;  %v2286_v1 = vpop.f32.mrb[42].mxu1 }
 0x457   : > { %v2287_v2 = vpop.f32.mrb[43].mxu1 }
 0x458   : > { %v2288_v3 = vadd.f32 %v2287_v2, %v2286_v1  ;;  %v1792_v46 = vadd.f32 %v2285_v0, %v3204_v61 }
 0x45a   : > { %v1795_v4 = vadd.f32 %v2288_v3, %v3204_v61 }
 0x45c   : > { %v2221_v5 = vpack.c.bf16 %v1795_v4, %v1792_v46  ;;  %v2289_v48 = vpop.f32.mrb[44].mxu1 }
 0x45d   : > { %v2290_v6 = vpop.f32.mrb[45].mxu1 }
 0x45e   : > { %2249 = vst [vmem:[%s3211_s27 + $0x10] sm:$0xff] %v2221_v5   ;;  %v2291_v7 = vadd.f32 %v2290_v6, %v2289_v48  ;;  %v2292_v8 = vpop.f32.mrb[46].mxu1 }
 0x45f   : > { %v2293_v9 = vpop.f32.mrb[47].mxu1 }
 0x460   : > { %v2294_v10 = vadd.f32 %v2293_v9, %v2292_v8  ;;  %v1800_v11 = vadd.f32 %v2291_v7, %v3204_v61 }
 0x462   : > { %v1803_v12 = vadd.f32 %v2294_v10, %v3204_v61 }
 0x464   : > { %v2226_v13 = vpack.c.bf16 %v1803_v12, %v1800_v11  ;;  %v2295_v14 = vpop.f32.mrb[48].mxu1 }
 0x465   : > { %v2296_v15 = vpop.f32.mrb[49].mxu1 }
 0x466   : > { %2250 = vst [vmem:[%s3211_s27 + $0x18] sm:$0xff] %v2226_v13   ;;  %v2297_v16 = vadd.f32 %v2296_v15, %v2295_v14  ;;  %v2298_v17 = vpop.f32.mrb[50].mxu1 }
 0x467   : > { %v2299_v18 = vpop.f32.mrb[51].mxu1 }
 0x468   : > { %v2300_v19 = vadd.f32 %v2299_v18, %v2298_v17  ;;  %v1808_v20 = vadd.f32 %v2297_v16, %v3204_v61 }
 0x46a   : > { %v1811_v21 = vadd.f32 %v2300_v19, %v3204_v61 }
 0x46c   : > { %v2231_v22 = vpack.c.bf16 %v1811_v21, %v1808_v20  ;;  %v2301_v23 = vpop.f32.mrb[52].mxu1 }
 0x46d   : > { %v2302_v24 = vpop.f32.mrb[53].mxu1 }
 0x46e   : > { %2251 = vst [vmem:[%s3211_s27 + $0x20] sm:$0xff] %v2231_v22   ;;  %v2303_v25 = vadd.f32 %v2302_v24, %v2301_v23  ;;  %v2304_v26 = vpop.f32.mrb[54].mxu1 }
 0x46f   : > { %v2305_v27 = vpop.f32.mrb[55].mxu1 }
 0x470   : > { %v2306_v28 = vadd.f32 %v2305_v27, %v2304_v26  ;;  %v1816_v29 = vadd.f32 %v2303_v25, %v3204_v61 }
 0x472   : > { %v1819_v30 = vadd.f32 %v2306_v28, %v3204_v61 }
 0x474   : > { %v2236_v31 = vpack.c.bf16 %v1819_v30, %v1816_v29  ;;  %v2307_v32 = vpop.f32.mrb[56].mxu1 }
 0x475   : > { %v2308_v33 = vpop.f32.mrb[57].mxu1 }
 0x476   : > { %2252 = vst [vmem:[%s3211_s27 + $0x28] sm:$0xff] %v2236_v31   ;;  %v2309_v34 = vadd.f32 %v2308_v33, %v2307_v32  ;;  %v2310_v35 = vpop.f32.mrb[58].mxu1 }
 0x477   : > { %v2311_v36 = vpop.f32.mrb[59].mxu1 }
 0x478   : > { %v2312_v37 = vadd.f32 %v2311_v36, %v2310_v35  ;;  %v1824_v38 = vadd.f32 %v2309_v34, %v3204_v61 }
 0x47a   : > { %v1827_v39 = vadd.f32 %v2312_v37, %v3204_v61 }
 0x47c   : > { %v2241_v40 = vpack.c.bf16 %v1827_v39, %v1824_v38  ;;  %v2313_v41 = vpop.f32.mrb[60].mxu1 }
 0x47d   : > { %v2314_v42 = vpop.f32.mrb[61].mxu1 }
 0x47e   : > { %2253 = vst [vmem:[%s3211_s27 + $0x30] sm:$0xff] %v2241_v40   ;;  %v2315_v49 = vadd.f32 %v2314_v42, %v2313_v41  ;;  %v2316_v54 = vpop.f32.mrb[62].mxu1 }
 0x47f   : > { %v2317_v43 = vpop.f32.mrb[63].mxu1 }
 0x480   : > { %v2318_v44 = vadd.f32 %v2317_v43, %v2316_v54  ;;  %v1832_v50 = vadd.f32 %v2315_v49, %v3204_v61 }
 0x482   : > { %v1835_v45 = vadd.f32 %v2318_v44, %v3204_v61 }
 0x484   : > { %v2246_v47 = vpack.c.bf16 %v1835_v45, %v1832_v50 }
 0x486   : > { %2254 = vst [vmem:[%s3211_s27 + $0x38] sm:$0xff] %v2246_v47  }
 0x487 PF: > { %s3275_s18 = smov %s2992_s30  ;;  %p21_p11 = scmp.ge.s32.totalorder %s2983_s26, 4  }
 0x488   : > { %s3276_s30 = smov %s2763_s10  ;;  %s3277_s10 = smov %s2767_s11 }
 0x489   : > { %s3278_s11 = smov %s3275_s18  ;;  %s3279_s12 = smov %s2983_s26 }
 0x48a   :  { %23 = sbr.rel (!%p21_p11) target bundleno = 7 (0x7), region = 112 }
 0x491   :  { %1940 = vsyncpa [#allocation3], 1 }
 0x492   :  { %1942 = vsyncpa [#allocation3 + $0x1], 1 }
 0x493   :  { %1943 = vsyncpa [#allocation5], 1 }
 0x494   :  { %1944 = vsyncpa [#allocation8], 1 }

</bundles_post_ra>
